<compile_context>
chip_gen: v7x
topology: tpu7x:2x2x1
jax: 0.10.0
libtpu: 0.0.40
codegen_flags: <defaults>
</compile_context>

<pallas_src>
import functools

import jax
import jax.numpy as jnp
from jax.experimental import pallas as pl
from jax.experimental.pallas import tpu as pltpu


def _attn_kernel(x_ref, gamma_ref, beta_ref, wqkv_ref, wout_ref, o_ref,
                 *, batch: int, seq: int, heads: int, dim_head: int,
                 eps: float = 1e-5):
    # x_ref: (B*N, dim) float32 (whole problem in one step).
    x = x_ref[...]
    rows, dim = x.shape
    inner = heads * dim_head

    # ---- LayerNorm over the last dim (f32 on VPU/EUP) ----
    mean = jnp.mean(x, axis=-1, keepdims=True)
    xc = x - mean
    var = jnp.mean(xc * xc, axis=-1, keepdims=True)
    xn = xc * jax.lax.rsqrt(var + eps)
    xn = xn * gamma_ref[...] + beta_ref[...]                  # (B*N, dim) f32

    # ---- qkv projection: one full-depth K=dim matmul over all B*N rows ----
    qkv = jnp.dot(xn.astype(jnp.bfloat16), wqkv_ref[...],
                  preferred_element_type=jnp.float32)         # (B*N, 3*inner) f32

    # ---- head split: single relayout on the packed qkv tensor ----
    # Column order of qkv is [q_h0..q_h{H-1} | k_h0.. | v_h0..], 32 lanes each.
    qkv = qkv.reshape(batch, seq, 3 * heads, dim_head)        # (B, N, 3H, d)
    qkv = jnp.transpose(qkv, (0, 2, 1, 3))                    # (B, 3H, N, d)

    scale = dim_head ** (-0.5)
    q = (qkv[:, 0 * heads:1 * heads] * scale).astype(jnp.bfloat16)
    k = qkv[:, 1 * heads:2 * heads].astype(jnp.bfloat16)
    v = qkv[:, 2 * heads:3 * heads].astype(jnp.bfloat16)

    g = batch * heads
    q = q.reshape(g, seq, dim_head)                           # (B*H, N, d) bf16
    k = k.reshape(g, seq, dim_head)
    v = v.reshape(g, seq, dim_head)

    # ---- batched scores over (batch*heads); no explicit k transpose ----
    s = jnp.einsum('gnd,gmd->gnm', q, k,
                   preferred_element_type=jnp.float32)        # (B*H, N, N) f32

    # ---- softmax in f32; approx reciprocal rides the idle EUP slot ----
    s = s - jnp.max(s, axis=-1, keepdims=True)
    p = jnp.exp(s)
    p = p * pl.reciprocal(jnp.sum(p, axis=-1, keepdims=True), approx=True)

    # ---- attention output per (batch, head) ----
    o = jnp.einsum('gnm,gmd->gnd', p.astype(jnp.bfloat16), v,
                   preferred_element_type=jnp.float32)        # (B*H, N, d) f32

    # ---- merge heads (single relayout) + one full-depth K=inner projection ----
    o = o.reshape(batch, heads, seq, dim_head)
    o = jnp.transpose(o, (0, 2, 1, 3)).reshape(rows, inner)   # (B*N, inner)
    out = jnp.dot(o.astype(jnp.bfloat16), wout_ref[...],
                  preferred_element_type=jnp.float32)         # (B*N, dim) f32
    o_ref[...] = out.astype(o_ref.dtype)


def attention_forward(x, gamma, beta, wqkv_t, wout_t, *, heads, dim_head):
    B, N, dim = x.shape
    inner = heads * dim_head
    assert wqkv_t.shape == (dim, 3 * inner)
    assert wout_t.shape == (inner, dim)

    # Fold (B, N) into the row dimension; lane-dense (rows, 128) layout.
    x2d = x.reshape(B * N, dim)

    # bf16 weights: MXU-friendly and half the DMA/VMEM bytes.
    wqkv_bf = wqkv_t.astype(jnp.bfloat16)
    wout_bf = wout_t.astype(jnp.bfloat16)

    kernel = functools.partial(_attn_kernel, batch=B, seq=N,
                               heads=heads, dim_head=dim_head)

    flops = (2 * B * N * dim * 3 * inner            # qkv projection
             + 2 * B * heads * N * N * dim_head     # scores
             + 2 * B * heads * N * N * dim_head     # attn @ v
             + 2 * B * N * inner * dim)             # output projection
    transcendentals = B * heads * N * N             # exp
    bytes_accessed = (x2d.size * 4 + wqkv_bf.size * 2 + wout_bf.size * 2
                      + gamma.size * 4 + beta.size * 4 + B * N * dim * 4)

    out2d = pl.pallas_call(
        kernel,
        out_shape=jax.ShapeDtypeStruct((B * N, dim), x.dtype),
        grid=(1,),
        in_specs=[
            pl.BlockSpec((B * N, dim), lambda i: (0, 0)),         # x rows
            pl.BlockSpec((1, dim), lambda i: (0, 0)),             # LN gamma
            pl.BlockSpec((1, dim), lambda i: (0, 0)),             # LN beta
            pl.BlockSpec((dim, 3 * inner), lambda i: (0, 0)),     # W_qkv^T
            pl.BlockSpec((inner, dim), lambda i: (0, 0)),         # W_out^T
        ],
        out_specs=pl.BlockSpec((B * N, dim), lambda i: (0, 0)),
        compiler_params=pltpu.CompilerParams(
            dimension_semantics=("arbitrary",)),
        cost_estimate=pl.CostEstimate(flops=flops,
                                      transcendentals=transcendentals,
                                      bytes_accessed=bytes_accessed),
    )(x2d, gamma, beta, wqkv_bf, wout_bf)
    return out2d.reshape(B, N, dim)


def _reference(x, gamma, beta, wqkv_t, wout_t, *, heads, dim_head, eps=1e-5):
    """Pure-JAX f32 reference mirroring the PyTorch forward."""
    mean = jnp.mean(x, axis=-1, keepdims=True)
    var = jnp.mean((x - mean) ** 2, axis=-1, keepdims=True)
    xn = (x - mean) / jnp.sqrt(var + eps) * gamma[0] + beta[0]
    qkv = xn @ wqkv_t
    inner = heads * dim_head
    q, k, v = jnp.split(qkv, 3, axis=-1)
    B, N, _ = x.shape

    def split_heads(t):  # b n (h d) -> b h n d
        return t.reshape(B, N, heads, dim_head).transpose(0, 2, 1, 3)

    q, k, v = map(split_heads, (q, k, v))
    s = jnp.einsum('bhnd,bhmd->bhnm', q, k) * dim_head ** (-0.5)
    p = jax.nn.softmax(s, axis=-1)
    o = jnp.einsum('bhnm,bhmd->bhnd', p, v)
    o = o.transpose(0, 2, 1, 3).reshape(B, N, inner)   # b h n d -> b n (h d)
    return o @ wout_t


if __name__ == "__main__":
    # Small, lane-dense shapes consistent with the module's forward.
    B, N, dim = 2, 16, 128
    heads, dim_head = 4, 32
    inner = heads * dim_head

    key = jax.random.PRNGKey(0)
    kx, kq, ko, kg, kb = jax.random.split(key, 5)

    x = jax.random.normal(kx, (B, N, dim), dtype=jnp.float32)

    # Deterministic synthetic parameters (Linear weights pre-transposed).
    wqkv_t = jax.random.normal(kq, (dim, 3 * inner), dtype=jnp.float32) * 0.05
    wout_t = jax.random.normal(ko, (inner, dim), dtype=jnp.float32) * 0.05
    gamma = jnp.ones((1, dim), dtype=jnp.float32) + \
        0.01 * jax.random.normal(kg, (1, dim), dtype=jnp.float32)
    beta = 0.01 * jax.random.normal(kb, (1, dim), dtype=jnp.float32)

    out = attention_forward(x, gamma, beta, wqkv_t, wout_t,
                            heads=heads, dim_head=dim_head)
    out = jax.block_until_ready(out)

    ref = _reference(x, gamma, beta, wqkv_t, wout_t,
                     heads=heads, dim_head=dim_head)
    # bf16 MXU operands + approx reciprocal => slightly looser tolerance.
    assert jnp.allclose(out, ref, atol=2e-2, rtol=2e-2), "mismatch vs reference"

    print("KERNEL_OK")
</pallas_src>

<mosaic_0001>
module attributes {stable_mosaic.version = 11 : i64} {
  func.func @_attn_kernel(%arg0: i32, %arg1: memref<32x128xf32, #tpu.memory_space<vmem>>, %arg2: memref<1x128xf32, #tpu.memory_space<vmem>>, %arg3: memref<1x128xf32, #tpu.memory_space<vmem>>, %arg4: memref<128x384xbf16, #tpu.memory_space<vmem>>, %arg5: memref<128x128xbf16, #tpu.memory_space<vmem>>, %arg6: memref<32x128xf32, #tpu.memory_space<vmem>>) attributes {dimension_semantics = [#tpu.dimension_semantics<arbitrary>], iteration_bounds = array<i64: 1>, scalar_prefetch = 0 : i64, scratch_operands = 0 : i64, tpu.core_type = #tpu.core_type<tc>, window_params = [{pipeline_mode = #tpu.pipeline_mode<synchronous>, transform_indices = @transform_0, window_bounds = array<i64: 32, 128>}, {pipeline_mode = #tpu.pipeline_mode<synchronous>, transform_indices = @transform_1, window_bounds = array<i64: 1, 128>}, {pipeline_mode = #tpu.pipeline_mode<synchronous>, transform_indices = @transform_2, window_bounds = array<i64: 1, 128>}, {pipeline_mode = #tpu.pipeline_mode<synchronous>, transform_indices = @transform_3, window_bounds = array<i64: 128, 384>}, {pipeline_mode = #tpu.pipeline_mode<synchronous>, transform_indices = @transform_4, window_bounds = array<i64: 128, 128>}, {pipeline_mode = #tpu.pipeline_mode<synchronous>, transform_indices = @transform_5, window_bounds = array<i64: 32, 128>}]} {
    %c0 = arith.constant 0 : index
    %c0_0 = arith.constant 0 : index
    %0 = vector.load %arg1[%c0, %c0_0] : memref<32x128xf32, #tpu.memory_space<vmem>>, vector<32x128xf32>
    %cst = arith.constant dense<0.000000e+00> : vector<32xf32>
    %1 = vector.multi_reduction <add>, %0, %cst [1] : vector<32x128xf32> to vector<32xf32>
    %2 = vector.shape_cast %1 : vector<32xf32> to vector<32x1xf32>
    %cst_1 = arith.constant 1.280000e+02 : f32
    %3 = vector.broadcast %cst_1 : f32 to vector<32x1xf32>
    %4 = arith.divf %2, %3 : vector<32x1xf32>
    %5 = vector.broadcast %4 : vector<32x1xf32> to vector<32x128xf32>
    %6 = arith.subf %0, %5 : vector<32x128xf32>
    %7 = arith.mulf %6, %6 : vector<32x128xf32>
    %cst_2 = arith.constant dense<0.000000e+00> : vector<32xf32>
    %8 = vector.multi_reduction <add>, %7, %cst_2 [1] : vector<32x128xf32> to vector<32xf32>
    %9 = vector.shape_cast %8 : vector<32xf32> to vector<32x1xf32>
    %cst_3 = arith.constant 1.280000e+02 : f32
    %10 = vector.broadcast %cst_3 : f32 to vector<32x1xf32>
    %11 = arith.divf %9, %10 : vector<32x1xf32>
    %cst_4 = arith.constant 9.99999974E-6 : f32
    %12 = vector.broadcast %cst_4 : f32 to vector<32x1xf32>
    %13 = arith.addf %11, %12 : vector<32x1xf32>
    %14 = math.rsqrt %13 : vector<32x1xf32>
    %15 = vector.broadcast %14 : vector<32x1xf32> to vector<32x128xf32>
    %16 = arith.mulf %6, %15 : vector<32x128xf32>
    %c0_5 = arith.constant 0 : index
    %c0_6 = arith.constant 0 : index
    %17 = vector.load %arg2[%c0_5, %c0_6] : memref<1x128xf32, #tpu.memory_space<vmem>>, vector<1x128xf32>
    %18 = vector.broadcast %17 : vector<1x128xf32> to vector<32x128xf32>
    %19 = arith.mulf %16, %18 : vector<32x128xf32>
    %c0_7 = arith.constant 0 : index
    %c0_8 = arith.constant 0 : index
    %20 = vector.load %arg3[%c0_7, %c0_8] : memref<1x128xf32, #tpu.memory_space<vmem>>, vector<1x128xf32>
    %21 = vector.broadcast %20 : vector<1x128xf32> to vector<32x128xf32>
    %22 = arith.addf %19, %21 : vector<32x128xf32>
    %23 = arith.truncf %22 : vector<32x128xf32> to vector<32x128xbf16>
    %c0_9 = arith.constant 0 : index
    %c0_10 = arith.constant 0 : index
    %24 = vector.load %arg4[%c0_9, %c0_10] : memref<128x384xbf16, #tpu.memory_space<vmem>>, vector<128x384xbf16>
    %cst_11 = arith.constant dense<0.000000e+00> : vector<32x384xf32>
    %25 = tpu.matmul %23, %24, %cst_11 {dimension_numbers = #tpu.dot_dimension_numbers<[1], [0], [0], [1], [0, 0, 1, 1], [], []>} : vector<32x128xbf16>, vector<128x384xbf16>, vector<32x384xf32> -> vector<32x384xf32>
    %26 = vector.shape_cast %25 : vector<32x384xf32> to vector<2x16x12x32xf32>
    %27 = tpu.transpose %26, [0, 2, 1, 3] : vector<2x16x12x32xf32> -> vector<2x12x16x32xf32>
    %28 = vector.extract_strided_slice %27 {offsets = [0, 0, 0, 0], sizes = [2, 4, 16, 32], strides = [1, 1, 1, 1]} : vector<2x12x16x32xf32> to vector<2x4x16x32xf32>
    %cst_12 = arith.constant 0.176776692 : f32
    %29 = vector.broadcast %cst_12 : f32 to vector<2x4x16x32xf32>
    %30 = arith.mulf %28, %29 : vector<2x4x16x32xf32>
    %31 = arith.truncf %30 : vector<2x4x16x32xf32> to vector<2x4x16x32xbf16>
    %32 = vector.extract_strided_slice %27 {offsets = [0, 4, 0, 0], sizes = [2, 4, 16, 32], strides = [1, 1, 1, 1]} : vector<2x12x16x32xf32> to vector<2x4x16x32xf32>
    %33 = arith.truncf %32 : vector<2x4x16x32xf32> to vector<2x4x16x32xbf16>
    %34 = vector.extract_strided_slice %27 {offsets = [0, 8, 0, 0], sizes = [2, 4, 16, 32], strides = [1, 1, 1, 1]} : vector<2x12x16x32xf32> to vector<2x4x16x32xf32>
    %35 = arith.truncf %34 : vector<2x4x16x32xf32> to vector<2x4x16x32xbf16>
    %36 = vector.shape_cast %31 : vector<2x4x16x32xbf16> to vector<8x16x32xbf16>
    %37 = vector.shape_cast %33 : vector<2x4x16x32xbf16> to vector<8x16x32xbf16>
    %38 = vector.shape_cast %35 : vector<2x4x16x32xbf16> to vector<8x16x32xbf16>
    "tpu.trace_start"() <{level = 10 : i32, message = "gnd,gmd->gnm"}> : () -> ()
    %cst_13 = arith.constant dense<0.000000e+00> : vector<8x16x16xf32>
    %39 = tpu.matmul %36, %37, %cst_13 {dimension_numbers = #tpu.dot_dimension_numbers<[2], [2], [1], [1], [0, 0, 0, 1, 1, 1], [0], [0]>} : vector<8x16x32xbf16>, vector<8x16x32xbf16>, vector<8x16x16xf32> -> vector<8x16x16xf32>
    "tpu.trace_stop"() : () -> ()
    %cst_14 = arith.constant dense<0xFF800000> : vector<8x16xf32>
    %40 = vector.multi_reduction <maximumf>, %39, %cst_14 [2] : vector<8x16x16xf32> to vector<8x16xf32>
    %41 = vector.shape_cast %40 : vector<8x16xf32> to vector<8x16x1xf32>
    %42 = vector.broadcast %41 : vector<8x16x1xf32> to vector<8x16x16xf32>
    %43 = arith.subf %39, %42 : vector<8x16x16xf32>
    %44 = math.exp %43 : vector<8x16x16xf32>
    %cst_15 = arith.constant dense<0.000000e+00> : vector<8x16xf32>
    %45 = vector.multi_reduction <add>, %44, %cst_15 [2] : vector<8x16x16xf32> to vector<8x16xf32>
    %46 = vector.shape_cast %45 : vector<8x16xf32> to vector<8x16x1xf32>
    %47 = tpu.reciprocal %46 {approx = true} : vector<8x16x1xf32> -> vector<8x16x1xf32>
    %48 = vector.broadcast %47 : vector<8x16x1xf32> to vector<8x16x16xf32>
    %49 = arith.mulf %44, %48 : vector<8x16x16xf32>
    %50 = arith.truncf %49 : vector<8x16x16xf32> to vector<8x16x16xbf16>
    "tpu.trace_start"() <{level = 10 : i32, message = "gnm,gmd->gnd"}> : () -> ()
    %cst_16 = arith.constant dense<0.000000e+00> : vector<8x16x32xf32>
    %51 = tpu.matmul %50, %38, %cst_16 {dimension_numbers = #tpu.dot_dimension_numbers<[2], [1], [1], [2], [0, 0, 0, 1, 1, 2], [0], [0]>} : vector<8x16x16xbf16>, vector<8x16x32xbf16>, vector<8x16x32xf32> -> vector<8x16x32xf32>
    "tpu.trace_stop"() : () -> ()
    %52 = vector.shape_cast %51 : vector<8x16x32xf32> to vector<2x4x16x32xf32>
    %53 = tpu.transpose %52, [0, 2, 1, 3] : vector<2x4x16x32xf32> -> vector<2x16x4x32xf32>
    %54 = vector.shape_cast %53 : vector<2x16x4x32xf32> to vector<32x128xf32>
    %55 = arith.truncf %54 : vector<32x128xf32> to vector<32x128xbf16>
    %c0_17 = arith.constant 0 : index
    %c0_18 = arith.constant 0 : index
    %56 = vector.load %arg5[%c0_17, %c0_18] : memref<128x128xbf16, #tpu.memory_space<vmem>>, vector<128x128xbf16>
    %cst_19 = arith.constant dense<0.000000e+00> : vector<32x128xf32>
    %57 = tpu.matmul %55, %56, %cst_19 {dimension_numbers = #tpu.dot_dimension_numbers<[1], [0], [0], [1], [0, 0, 1, 1], [], []>} : vector<32x128xbf16>, vector<128x128xbf16>, vector<32x128xf32> -> vector<32x128xf32>
    %c0_20 = arith.constant 0 : index
    %c0_21 = arith.constant 0 : index
    %58 = vector.load %arg6[%c0_20, %c0_21] : memref<32x128xf32, #tpu.memory_space<vmem>>, vector<32x128xf32>
    tpu.vector_store %arg6[%c0_20, %c0_21], %57 {strides = array<i32>} : memref<32x128xf32, #tpu.memory_space<vmem>>, vector<32x128xf32>,
    return
  }
  func.func @transform_0(%arg0: i32) -> (i32, i32) {
    %c0_i32 = arith.constant 0 : i32
    %c0_i32_0 = arith.constant 0 : i32
    %c0_i32_1 = arith.constant 0 : i32
    return %c0_i32, %c0_i32_0 : i32, i32
  }
  func.func @transform_1(%arg0: i32) -> (i32, i32) {
    %c0_i32 = arith.constant 0 : i32
    %c0_i32_0 = arith.constant 0 : i32
    %c0_i32_1 = arith.constant 0 : i32
    return %c0_i32, %c0_i32_0 : i32, i32
  }
  func.func @transform_2(%arg0: i32) -> (i32, i32) {
    %c0_i32 = arith.constant 0 : i32
    %c0_i32_0 = arith.constant 0 : i32
    %c0_i32_1 = arith.constant 0 : i32
    return %c0_i32, %c0_i32_0 : i32, i32
  }
  func.func @transform_3(%arg0: i32) -> (i32, i32) {
    %c0_i32 = arith.constant 0 : i32
    %c0_i32_0 = arith.constant 0 : i32
    %c0_i32_1 = arith.constant 0 : i32
    return %c0_i32, %c0_i32_0 : i32, i32
  }
  func.func @transform_4(%arg0: i32) -> (i32, i32) {
    %c0_i32 = arith.constant 0 : i32
    %c0_i32_0 = arith.constant 0 : i32
    %c0_i32_1 = arith.constant 0 : i32
    return %c0_i32, %c0_i32_0 : i32, i32
  }
  func.func @transform_5(%arg0: i32) -> (i32, i32) {
    %c0_i32 = arith.constant 0 : i32
    %c0_i32_0 = arith.constant 0 : i32
    %c0_i32_1 = arith.constant 0 : i32
    return %c0_i32, %c0_i32_0 : i32, i32
  }
}

</mosaic_0001>

<bundles_post_ra>
// kernel: tpu_custom_call.1
= control target key start
LH: loop header
LB: loop body
LE: loop exit
PB: predicated region body
PF: predicated region fallthrough
CT: control target
= control target key end

     0   :  { %10 = vsyncpa [#allocation3], 0  ;;  %s5454_s0 = inlined_call_operand.hbm [shape: f32[32,128], index: 0, kind: input, shape index: {}]   ;;  %s5455_s1 = inlined_call_operand.vmem [shape: f32[1,128], index: 1, kind: input, shape index: {}]   ;;  %s5456_s2 = inlined_call_operand.vmem [shape: f32[1,128], index: 2, kind: input, shape index: {}]   ;;  %s5457_s3 = inlined_call_operand.hbm [shape: bf16[128,384], index: 3, kind: input, shape index: {}]   ;;  %s5458_s4 = inlined_call_operand.hbm [shape: bf16[128,128], index: 4, kind: input, shape index: {}]   ;;  %s5459_s5 = inlined_call_operand.hbm [shape: f32[32,128], index: 5, kind: output, shape index: {}]  }
   0x1   :  { %11 = vsyncpa [#allocation6], 0 }
   0x2   :  { %12 = vsyncpa [#allocation4], 0  ;;  %s4386_s18 = smov [#allocation5]   ;;  %s4292_s22 = scalar_lea.hbm %s5457_s3, 3072 }
   0x3   :  { %s34_s19 = sshll.u32 %s4386_s18, 4  ;;  %p4293_p0 = scmp.ne.s32.totalorder %s5457_s3, %s4292_s22  ;;  %s35_s19 = int_to_ptr.vmem [resolvable:$true] %s34_s19 }
   0x4   :  { %p4296_p1 = scmp.lt.u32.totalorder %s4292_s22, %s5457_s3 }
   0x6   :  { %p4298_p2 = pnand %p4296_p1, %p4293_p0 }
   0x8   :  { %4301 = shalt.err (!%p4298_p2)
}
   0x9   :  { %s4302_s27 = scalar_lea.vmem %s35_s19, 3072  ;;  %p4307_p4 = scmp.lt.s32.totalorder %s35_s19, %s35_s19 }
   0xa   :  { %p4303_p3 = scmp.ne.s32.totalorder %s35_s19, %s4302_s27  ;;  %p4308_p5 = scmp.lt.s32.totalorder %s4302_s27, %s4302_s27 }
   0xc   :  { %p4309_p6 = por %p4308_p5, %p4307_p4 }
   0xe   :  { %p4310_p7 = pnand %p4309_p6, %p4303_p3 }
  0x10   :  { %4313 = shalt.err (!%p4310_p7)
}
  0x11   :  { %s4387_s28 = smov 192   ;;  %s4388_s29 = smov 12  }
  0x12   :  { %40 = dma.hbm_to_vmem [thread:$0]  %s5457_s3, 3072, %s35_s19, [#allocation6], %s4387_s28, %s4387_s28, %s4388_s29  }
  0x13   :  { %s4389_s7 = smov [#allocation2]   ;;  %s4314_s11 = scalar_lea.hbm %s5454_s0, 512 }
  0x14   :  { %s18_s8 = sshll.u32 %s4389_s7, 4  ;;  %p4315_p8 = scmp.ne.s32.totalorder %s5454_s0, %s4314_s11  ;;  %s19_s8 = int_to_ptr.vmem [resolvable:$true] %s18_s8 }
  0x15   :  { %p4318_p9 = scmp.lt.u32.totalorder %s4314_s11, %s5454_s0 }
  0x17   :  { %p4320_p10 = pnand %p4318_p9, %p4315_p8 }
  0x19   :  { %4323 = shalt.err (!%p4320_p10)
}
  0x1a   :  { %s4324_s16 = scalar_lea.vmem %s19_s8, 512  ;;  %p4329_p12 = scmp.lt.s32.totalorder %s19_s8, %s19_s8 }
  0x1b   :  { %p4325_p11 = scmp.ne.s32.totalorder %s19_s8, %s4324_s16  ;;  %p4330_p13 = scmp.lt.s32.totalorder %s4324_s16, %s4324_s16 }
  0x1d   :  { %p4331_p0 = por %p4330_p13, %p4329_p12 }
  0x1f   :  { %p4332_p1 = pnand %p4331_p0, %p4325_p11 }
  0x21   :  { %4335 = shalt.err (!%p4332_p1)
}
  0x22   :  { %s4390_s3 = smov 128   ;;  %s4391_s17 = smov 8  }
  0x23   :  { %24 = dma.hbm_to_vmem [thread:$0]  %s5454_s0, 512, %s19_s8, [#allocation3], %s4390_s3, %s4390_s3, %s4391_s17  }
  0x24   :  { %s4392_s20 = smov [#allocation7]   ;;  %s4336_s24 = scalar_lea.hbm %s5458_s4, 1024 }
  0x25   :  { %s46_s21 = sshll.u32 %s4392_s20, 4  ;;  %p4337_p2 = scmp.ne.s32.totalorder %s5458_s4, %s4336_s24  ;;  %s47_s21 = int_to_ptr.vmem [resolvable:$true] %s46_s21 }
  0x26   :  { %p4340_p3 = scmp.lt.u32.totalorder %s4336_s24, %s5458_s4 }
  0x28   :  { %p4342_p4 = pnand %p4340_p3, %p4337_p2 }
  0x2a   :  { %4345 = shalt.err (!%p4342_p4)
}
  0x2b   :  { %s4346_s29 = scalar_lea.vmem %s47_s21, 1024  ;;  %p4351_p6 = scmp.lt.s32.totalorder %s47_s21, %s47_s21 }
  0x2c   :  { %p4347_p5 = scmp.ne.s32.totalorder %s47_s21, %s4346_s29  ;;  %p4352_p7 = scmp.lt.s32.totalorder %s4346_s29, %s4346_s29 }
  0x2e   :  { %p4353_p8 = por %p4352_p7, %p4351_p6 }
  0x30   :  { %p4354_p9 = pnand %p4353_p8, %p4347_p5 }
  0x32   :  { %4357 = shalt.err (!%p4354_p9)
}
  0x33   :  { %s4393_s0 = smov 64   ;;  %s4394_s30 = smov 4  }
  0x34   :  { %52 = dma.hbm_to_vmem [thread:$0]  %s5458_s4, 1024, %s47_s21, [#allocation6], %s4393_s0, %s4393_s0, %s4394_s30  }
  0x35   :  { %4380 = dma.done.wait [#allocation3], 512  }
  0x36   :  { %4381 = vsyncadd [#allocation3], 4294966784 }
  0x37   :  { %4382 = dma.done.wait [#allocation6], 4096  }
  0x38   :  { %4383 = vsyncadd [#allocation6], 4294963200  ;;  %v63_v0 = vld [vmem:[#allocation2] sm:$0xff]  ;;  %v65_v1 = vld [vmem:[#allocation2 + $0x10] sm:$0xff]  ;;  %v4395_v39 = vmov 0   ;;  %vm4399_vm0 = vmmov 0  }
  0x39   :  { %v64_v2 = vld [vmem:[#allocation2 + $0x8] sm:$0xff]  ;;  %67 = vadd.xlane.f32.xlu0 %v63_v0  ;;  %71 = vadd.xlane.f32.xlu1 %v65_v1  ;;  %v66_v3 = vld [vmem:[#allocation2 + $0x18] sm:$0xff]  ;;  %v4180_v4 = vld [vmem:[#allocation5 + $0x4] ss:$12 sps:$4 sm:$0xff]   ;;  %vm2190_vm1 = vcmask 261120   ;;  %vm2567_vm2 = vcmask 130048  }
  0x3a   :  { %v4182_v5 = vld [vmem:[#allocation5] ss:$12 sps:$4 sm:$0xff]   ;;  %v4183_v6 = vld [vmem:[#allocation5 + $0x1c] ss:$12 sps:$4 sm:$0xff]   ;;  %296 = vmatprep.subr.bf16.mxu0 %v4180_v4  ;;  %v4186_v24 = vld [vmem:[#allocation5 + $0x18] ss:$12 sps:$4 sm:$0xff]   ;;  %328 = vmatprep.mubr.bf16.mxu0 %v4395_v39 }
  0x3b   :  { %v4185_v7 = vld [vmem:[#allocation5 + $0x8] ss:$12 sps:$4 sm:$0xff]   ;;  %297 = vmatpush1.bf16.msra.mxu0 %v4182_v5  ;;  %v4189_v26 = vld [vmem:[#allocation5 + $0x20] ss:$12 sps:$4 sm:$0xff]   ;;  %v4190_v27 = vld [vmem:[#allocation5 + $0x30] ss:$12 sps:$4 sm:$0xff]  }
  0x3c   :  { %3997 = vmatprep.subr.bf16.mxu1 %v4185_v7  ;;  %298 = vmatprep.subr.bf16.mxu0 %v4183_v6  ;;  %v4187_v25 = vld [vmem:[#allocation5 + $0x34] ss:$12 sps:$4 sm:$0xff]   ;;  %v4191_v28 = vld [vmem:[#allocation5 + $0x4c] ss:$12 sps:$4 sm:$0xff]   ;;  %v4195_v31 = vld [vmem:[#allocation5 + $0x64] ss:$12 sps:$4 sm:$0xff]  }
  0x3d   :  { %69 = vadd.xlane.f32.xlu0 %v64_v2  ;;  %73 = vadd.xlane.f32.xlu1 %v66_v3  ;;  %v4193_v29 = vld [vmem:[#allocation5 + $0x38] ss:$12 sps:$4 sm:$0xff]   ;;  %v4194_v30 = vld [vmem:[#allocation5 + $0x48] ss:$12 sps:$4 sm:$0xff]   ;;  %v4197_v32 = vld [vmem:[#allocation5 + $0x50] ss:$12 sps:$4 sm:$0xff]  }
  0x3e   :  { %3998 = vmatpush3.bf16.msra.mxu1 %v4185_v7  ;;  %v4198_v33 = vld [vmem:[#allocation5 + $0x60] ss:$12 sps:$4 sm:$0xff]   ;;  %v4199_v34 = vld [vmem:[#allocation5 + $0x7c] ss:$12 sps:$4 sm:$0xff]   ;;  %v4202_v36 = vld [vmem:[#allocation5 + $0x78] ss:$12 sps:$4 sm:$0xff]  }
  0x3f   :  { %299 = vmatpush1.bf16.msra.mxu0 %v4186_v24  ;;  %3999 = vmatprep.subr.bf16.mxu1 %v4189_v26  ;;  %v4201_v35 = vld [vmem:[#allocation5 + $0x68] ss:$12 sps:$4 sm:$0xff]   ;;  %v4205_v38 = vld [vmem:[#allocation5 + $0x80] ss:$12 sps:$4 sm:$0xff]   ;;  %v4206_v40 = vld [vmem:[#allocation5 + $0x90] ss:$12 sps:$4 sm:$0xff]  }
  0x40   :  { %300 = vmatprep.subr.bf16.mxu0 %v4187_v25  ;;  %v4203_v37 = vld [vmem:[#allocation5 + $0x94] ss:$12 sps:$4 sm:$0xff]   ;;  %v4207_v41 = vld [vmem:[#allocation5 + $0xac] ss:$12 sps:$4 sm:$0xff]   ;;  %v4211_v44 = vld [vmem:[#allocation5 + $0xb0] ss:$12 sps:$4 sm:$0xff]  }
  0x41   :  { %v4209_v42 = vld [vmem:[#allocation5 + $0x98] ss:$12 sps:$4 sm:$0xff]   ;;  %v4210_v43 = vld [vmem:[#allocation5 + $0xa8] ss:$12 sps:$4 sm:$0xff]   ;;  %v3847_v59 = vld [vmem:[%s5455_s1] ss:$0 sm:$0xff] }
  0x42   :  { %4000 = vmatpush3.bf16.msra.mxu1 %v4189_v26  ;;  %s4396_s1 = smov 96   ;;  %v4398_v25 = vmov 0.0   ;;  %v4400_v26 = vmov 1983009808   ;;  %vm3700_vm3 = vcmask 523264   ;;  %vm3705_vm4 = vcmask 785408  }
  0x43   :  { %301 = vmatpush1.bf16.msra.mxu0 %v4190_v27  ;;  %4001 = vmatprep.subr.bf16.mxu1 %v4193_v29  ;;  %v521_v27 = vunpack.c.l.s4 %v4400_v26  ;;  %s4402_s11 = smov [#allocation8]  }
  0x44   :  { %302 = vmatprep.subr.bf16.mxu0 %v4191_v28  ;;  %v523_v28 = vlaneseq  ;;  %s3834_s12 = sshll.u32 %s4402_s11, 4  ;;  %s3835_s12 = int_to_ptr.vmem [resolvable:$true] %s3834_s12 }
  0x45   :  { %s4358_s13 = scalar_lea.vmem %s3835_s12, 512  ;;  %p4363_p11 = scmp.lt.s32.totalorder %s3835_s12, %s3835_s12 }
  0x46   :  { %4002 = vmatpush3.bf16.msra.mxu1 %v4193_v29  ;;  %p4359_p10 = scmp.ne.s32.totalorder %s3835_s12, %s4358_s13  ;;  %p4364_p12 = scmp.lt.s32.totalorder %s4358_s13, %s4358_s13 }
  0x47   :  { %303 = vmatpush1.bf16.msra.mxu0 %v4194_v30  ;;  %4003 = vmatprep.subr.bf16.mxu1 %v4197_v32 }
  0x48   :  { %304 = vmatprep.subr.bf16.mxu0 %v4195_v31  ;;  %v4401_v31 = vmov 1934713408   ;;  %p4365_p13 = por %p4364_p12, %p4363_p11 }
  0x4a   :  { %4004 = vmatpush3.bf16.msra.mxu1 %v4197_v32  ;;  %v585_v32 = vunpack.c.l.s4 %v4401_v31  ;;  %p4366_p0 = pnand %p4365_p13, %p4359_p10 }
  0x4b   :  { %305 = vmatpush1.bf16.msra.mxu0 %v4198_v33  ;;  %4005 = vmatprep.subr.bf16.mxu1 %v4201_v35  ;;  %v522_v33 = vunpack.c.0.s8 %v521_v27 }
  0x4c   :  { %306 = vmatprep.subr.bf16.mxu0 %v4199_v34  ;;  %v524_v34 = vshrl.u32 %v523_v28, 7 }
  0x4e   :  { %4006 = vmatpush3.bf16.msra.mxu1 %v4201_v35 }
  0x4f   :  { %307 = vmatpush1.bf16.msra.mxu0 %v4202_v36  ;;  %4007 = vmatprep.subr.bf16.mxu1 %v4205_v38 }
  0x50   :  { %308 = vmatprep.subr.bf16.mxu0 %v4203_v37  ;;  %v586_v37 = vunpack.c.0.s8 %v585_v32 }
  0x52   :  { %4008 = vmatpush3.bf16.msra.mxu1 %v4205_v38  ;;  %v4592_v38 = vsub.s32 %v522_v33, %v524_v34 }
  0x53   :  { %309 = vmatpush1.bf16.msra.mxu0 %v4206_v40  ;;  %4009 = vmatprep.subr.bf16.mxu1 %v4209_v42 }
  0x54   :  { %310 = vmatprep.subr.bf16.mxu0 %v4207_v41 }
  0x56   :  { %4010 = vmatpush3.bf16.msra.mxu1 %v4209_v42 }
  0x57   :  { %311 = vmatpush1.bf16.msra.mxu0 %v4210_v43  ;;  %4011 = vmatprep.subr.bf16.mxu1 %v4211_v44 }
  0x58   :  { %4017 = vmatprep.subr.bf16.mxu0 %v4398_v25 }
  0x5a   :  { %4012 = vmatpush3.bf16.msra.mxu1 %v4211_v44 }
  0x5b   :  { %4029 = vmatprep.subr.bf16.mxu1 %v4398_v25 }
  0xc6   :  { %v68_v8 = vpop.xlane.xlu0 %67  ;;  %v72_v9 = vpop.xlane.xlu1 %71 }
  0xc7   :  { %v76_v10 = vmul.f32 0.0078125, %v68_v8  ;;  %v78_v11 = vmul.f32 0.0078125, %v72_v9 }
  0xc9   :  { %v4474_v12 = vsub.f32 %v63_v0, %v76_v10  ;;  %v4476_v13 = vsub.f32 %v65_v1, %v78_v11  ;;  %v3848_v0 = vld [vmem:[%s5456_s2] ss:$0 sm:$0xff]  ;;  %s4397_s2 = smov 32  }
  0xca   :  { %v70_v14 = vpop.xlane.xlu0 %69  ;;  %v74_v15 = vpop.xlane.xlu1 %73 }
  0xcb   :  { %v77_v16 = vmul.f32 0.0078125, %v70_v14  ;;  %v84_v17 = vmul.f32 %v4474_v12, %v4474_v12  ;;  %v79_v18 = vmul.f32 0.0078125, %v74_v15  ;;  %v86_v21 = vmul.f32 %v4476_v13, %v4476_v13 }
  0xcd   :  { %v4480_v19 = vsub.f32 %v64_v2, %v77_v16  ;;  %88 = vadd.xlane.f32.xlu0 %v84_v17  ;;  %v4482_v20 = vsub.f32 %v66_v3, %v79_v18 }
  0xcf   :  { %v85_v22 = vmul.f32 %v4480_v19, %v4480_v19  ;;  %v87_v23 = vmul.f32 %v4482_v20, %v4482_v20 }
  0xd1   :  { %92 = vadd.xlane.f32.xlu0 %v86_v21  ;;  %90 = vadd.xlane.f32.xlu1 %v85_v22 }
  0xd5   :  { %94 = vadd.xlane.f32.xlu1 %v87_v23 }
 0x15a   :  { %v89_v45 = vpop.xlane.xlu0 %88 }
 0x15b   :  { %v96_v46 = vmul.f32 0.0078125, %v89_v45  ;;  %v4596_v45 = vsub.s32 %v586_v37, %v524_v34 }
 0x15d   :  { %v100_v47 = vadd.f32 1e-05, %v96_v46 }
 0x15e   :  { %v91_v48 = vpop.xlane.xlu1 %90  ;;  %v93_v49 = vpop.xlane.xlu0 %92 }
 0x15f   :  { %4220 = vrsqrt.f32 %v100_v47  ;;  %v97_v50 = vmul.f32 0.0078125, %v91_v48  ;;  %v98_v51 = vmul.f32 0.0078125, %v93_v49 }
 0x161   :  { %v101_v52 = vadd.f32 1e-05, %v97_v50  ;;  %v102_v53 = vadd.f32 1e-05, %v98_v51 }
 0x162   :  { %v95_v54 = vpop.xlane.xlu1 %94 }
 0x163   :  { %4222 = vrsqrt.f32 %v101_v52  ;;  %v99_v55 = vmul.f32 0.0078125, %v95_v54 }
 0x164   :  { %4224 = vrsqrt.f32 %v102_v53 }
 0x165   :  { %v103_v56 = vadd.f32 1e-05, %v99_v55 }
 0x167   :  { %4226 = vrsqrt.f32 %v103_v56 }
 0x169   :  { %v4221_v57 = vpop.eup %4220 }
 0x16a   :  { %v108_v58 = vmul.f32 %v4221_v57, %v4474_v12 }
 0x16c   :  { %v119_v63 = vmul.f32 %v3847_v59, %v108_v58 }
 0x16d   :  { %v4223_v60 = vpop.eup %4222 }
 0x16e   :  { %v4225_v61 = vpop.eup %4224  ;;  %v109_v62 = vmul.f32 %v4223_v60, %v4480_v19  ;;  %v130_v4 = vadd.f32 %v3848_v0, %v119_v63 }
 0x16f   :  { %v110_v1 = vmul.f32 %v4225_v61, %v4476_v13 }
 0x170   :  { %v120_v2 = vmul.f32 %v3847_v59, %v109_v62 }
 0x171   :  { %v4227_v3 = vpop.eup %4226  ;;  %v121_v7 = vmul.f32 %v3847_v59, %v110_v1 }
 0x172   :  { %v131_v5 = vadd.f32 %v3848_v0, %v120_v2  ;;  %v111_v6 = vmul.f32 %v4227_v3, %v4482_v20 }
 0x173   :  { %v132_v10 = vadd.f32 %v3848_v0, %v121_v7 }
 0x174   :  { %v134_v8 = vpack.c.bf16 %v131_v5, %v130_v4  ;;  %v122_v9 = vmul.f32 %v3847_v59, %v111_v6 }
 0x176   :  { %329 = vmatmul.mubr.bf16.vlgmr.msra.gmra.mrb[0].mxu0 %v134_v8  ;;  %4013 = vmatprep.mubr.bf16.mxu1 %v134_v8  ;;  %v133_v11 = vadd.f32 %v3848_v0, %v122_v9 }
 0x177   :  { %338 = vmatprep.mubr.bf16.mxu0 %v4395_v39 }
 0x178   :  { %v135_v12 = vpack.c.bf16 %v133_v11, %v132_v10 }
 0x17a   :  { %4014 = vmatmul.mubr.bf16.vlgmr.msra.gmra.mrb[0].mxu1 %v135_v12 }
 0x17b   :  { %4031 = vmatprep.mubr.msk.bf16.mxu1 %vm4399_vm0, %v4398_v25 }
 0x17e   :  { %339 = vmatmul.mubr.bf16.gmra.mrb[4].mxu0 %v135_v12 }
 0x17f   :  { %4019 = vmatprep.mubr.msk.bf16.mxu0 %vm4399_vm0, %v4398_v25 }
 0x249   :  { %v4500_v14 = vpop.f32.mrb[0].mxu0 }
 0x24a   :  { %402 = vrot.lane.b32.xlu0 %v4500_v14, %s4396_s1  ;;  %v4504_v13 = vpop.f32.mrb[1].mxu0 }
 0x24b   :  { %454 = vrot.lane.b32.xlu1 %v4504_v13, %s4393_s0  ;;  %v4508_v15 = vpop.f32.mrb[2].mxu0 }
 0x24c   :  { %v4510_v16 = vpop.f32.mrb[3].mxu0 }
 0x24d   :  { %v4512_v17 = vpop.f32.mrb[0].mxu1 }
 0x24e   :  { %442 = vrot.lane.b32.xlu0 %v4504_v13, %s4396_s1  ;;  %v4516_v18 = vpop.f32.mrb[1].mxu1 }
 0x24f   :  { %404 = vrot.lane.b32.xlu1 %v4508_v15, %s4396_s1  ;;  %v4520_v19 = vpop.f32.mrb[2].mxu1 }
 0x250   :  { %v4522_v20 = vpop.f32.mrb[3].mxu1 }
 0x251   :  { %v4524_v21 = vpop.f32.mrb[4].mxu0 }
 0x252   :  { %466 = vrot.lane.b32.xlu0 %v4504_v13, %s4397_s2  ;;  %v4528_v22 = vpop.f32.mrb[5].mxu0 }
 0x253   :  { %444 = vrot.lane.b32.xlu1 %v4510_v16, %s4396_s1  ;;  %v4532_v23 = vpop.f32.mrb[6].mxu0 }
 0x254   :  { %v4534_v24 = vpop.f32.mrb[7].mxu0 }
 0x256   :  { %414 = vrot.lane.b32.xlu0 %v4500_v14, %s4393_s0 }
 0x257   :  { %456 = vrot.lane.b32.xlu1 %v4510_v16, %s4393_s0 }
 0x25a   :  { %426 = vrot.lane.b32.xlu0 %v4500_v14, %s4397_s2 }
 0x25b   :  { %468 = vrot.lane.b32.xlu1 %v4510_v16, %s4397_s2 }
 0x25e   :  { %406 = vrot.lane.b32.xlu0 %v4524_v21, %s4396_s1 }
 0x25f   :  { %416 = vrot.lane.b32.xlu1 %v4508_v15, %s4393_s0 }
 0x262   :  { %446 = vrot.lane.b32.xlu0 %v4528_v22, %s4396_s1 }
 0x263   :  { %428 = vrot.lane.b32.xlu1 %v4508_v15, %s4397_s2 }
 0x266   :  { %458 = vrot.lane.b32.xlu0 %v4528_v22, %s4393_s0 }
 0x267   :  { %408 = vrot.lane.b32.xlu1 %v4532_v23, %s4396_s1 }
 0x26a   :  { %470 = vrot.lane.b32.xlu0 %v4528_v22, %s4397_s2 }
 0x26b   :  { %448 = vrot.lane.b32.xlu1 %v4534_v24, %s4396_s1 }
 0x26e   :  { %418 = vrot.lane.b32.xlu0 %v4524_v21, %s4393_s0 }
 0x26f   :  { %460 = vrot.lane.b32.xlu1 %v4534_v24, %s4393_s0 }
 0x272   :  { %430 = vrot.lane.b32.xlu0 %v4524_v21, %s4397_s2 }
 0x273   :  { %472 = vrot.lane.b32.xlu1 %v4534_v24, %s4397_s2 }
 0x276   :  { %482 = vrot.lane.b32.xlu0 %v4516_v18, %s4396_s1 }
 0x277   :  { %420 = vrot.lane.b32.xlu1 %v4532_v23, %s4393_s0 }
 0x27a   :  { %506 = vrot.lane.b32.xlu0 %v4516_v18, %s4397_s2 }
 0x27b   :  { %432 = vrot.lane.b32.xlu1 %v4532_v23, %s4397_s2 }
 0x27f   :  { %484 = vrot.lane.b32.xlu1 %v4522_v20, %s4396_s1 }
 0x283   :  { %494 = vrot.lane.b32.xlu1 %v4516_v18, %s4393_s0 }
 0x287   :  { %496 = vrot.lane.b32.xlu1 %v4522_v20, %s4393_s0 }
 0x28b   :  { %508 = vrot.lane.b32.xlu1 %v4522_v20, %s4397_s2 }
 0x2bc   :  { %v403_v29 = vpop.permute.xlu0 %402 }
 0x2bd   :  { %v455_v30 = vpop.permute.xlu1 %454 }
 0x2be   :  { %v550_v39 = vcombine.low %v4504_v13, %v455_v30  ;;  %v551_v40 = vcombine.high %v4504_v13, %v455_v30 }
 0x2c0   :  { %v443_v35 = vpop.permute.xlu0 %442  ;;  %v558_v46 = vrot.slane %v550_v39, %v4592_v38  ;;  %v565_v47 = vrot.slane %v551_v40, %v4592_v38 }
 0x2c1   :  { %v4590_v36 = vpop.permute.xlu1 %404 }
 0x2c4   :  { %v467_v41 = vpop.permute.xlu0 %466 }
 0x2c5   :  { %v566_v42 = vcombine.low %v443_v35, %v467_v41  ;;  %v567_v43 = vcombine.high %v443_v35, %v467_v41  ;;  %v445_v44 = vpop.permute.xlu1 %444 }
 0x2c7   :  { %v574_v48 = vrot.slane %v566_v42, %v4592_v38  ;;  %v581_v49 = vrot.slane %v567_v43, %v4592_v38 }
 0x2c8   :  { %v415_v50 = vpop.permute.xlu0 %414 }
 0x2c9   :  { %v614_v51 = vcombine.low %v558_v46, %v574_v48  ;;  %v615_v52 = vcombine.high %v558_v46, %v574_v48  ;;  %v630_v53 = vcombine.low %v565_v47, %v581_v49  ;;  %v631_v54 = vcombine.high %v565_v47, %v581_v49  ;;  %v457_v55 = vpop.permute.xlu1 %456 }
 0x2ca   :  { %v518_v56 = vcombine.low %v4500_v14, %v415_v50  ;;  %v519_v57 = vcombine.high %v4500_v14, %v415_v50  ;;  %v754_v58 = vcombine.low %v4510_v16, %v457_v55  ;;  %v755_v59 = vcombine.high %v4510_v16, %v457_v55 }
 0x2cb   :  { %v622_v60 = vrot.slane %v614_v51, %v4596_v45  ;;  %v629_v61 = vrot.slane %v615_v52, %v4596_v45  ;;  %v638_v62 = vrot.slane %v630_v53, %v4596_v45  ;;  %v645_v63 = vrot.slane %v631_v54, %v4596_v45 }
 0x2cc   :  { %v526_v0 = vrot.slane %v518_v56, %v4592_v38  ;;  %v533_v1 = vrot.slane %v519_v57, %v4592_v38  ;;  %v762_v2 = vrot.slane %v754_v58, %v4592_v38  ;;  %v769_v3 = vrot.slane %v755_v59, %v4592_v38  ;;  %v427_v4 = vpop.permute.xlu0 %426 }
 0x2cd   :  { %v3874_v5 = vcombine.low %v622_v60, %v629_v61  ;;  %v3876_v6 = vcombine.high %v622_v60, %v629_v61  ;;  %v3878_v7 = vcombine.low %v638_v62, %v645_v63  ;;  %v3880_v8 = vcombine.high %v638_v62, %v645_v63  ;;  %v469_v9 = vpop.permute.xlu1 %468 }
 0x2ce   :  { %v534_v10 = vcombine.low %v403_v29, %v427_v4  ;;  %v535_v11 = vcombine.high %v403_v29, %v427_v4  ;;  %v770_v12 = vcombine.low %v445_v44, %v469_v9  ;;  %v771_v14 = vcombine.high %v445_v44, %v469_v9 }
 0x2cf   :  { %v4615_v13 = vrot.slane %v3874_v5, %v4592_v38  ;;  %v4618_v16 = vrot.slane %v3876_v6, %v4592_v38  ;;  %v4621_v26 = vrot.slane %v3878_v7, %v4592_v38  ;;  %v4624_v27 = vrot.slane %v3880_v8, %v4592_v38 }
 0x2d0   :  { %v542_v28 = vrot.slane %v534_v10, %v4592_v38  ;;  %v549_v30 = vrot.slane %v535_v11, %v4592_v38  ;;  %v778_v29 = vrot.slane %v770_v12, %v4592_v38  ;;  %v785_v31 = vrot.slane %v771_v14, %v4592_v38  ;;  %v4630_v32 = vpop.permute.xlu0 %406 }
 0x2d1   :  { %v417_v33 = vpop.permute.xlu1 %416  ;;  %v1414_v34 = vcombine.low %v4615_v13, %v4618_v16  ;;  %v1446_v35 = vcombine.low %v4621_v26, %v4624_v27  ;;  %v1415_v37 = vcombine.high %v4615_v13, %v4618_v16  ;;  %v1447_v39 = vcombine.high %v4621_v26, %v4624_v27 }
 0x2d2   :  { %v582_v40 = vcombine.low %v526_v0, %v542_v28  ;;  %v583_v41 = vcombine.high %v526_v0, %v542_v28  ;;  %v598_v42 = vcombine.low %v533_v1, %v549_v30  ;;  %v599_v43 = vcombine.high %v533_v1, %v549_v30 }
 0x2d3   :  { %v818_v44 = vcombine.low %v762_v2, %v778_v29  ;;  %v819_v46 = vcombine.high %v762_v2, %v778_v29  ;;  %v834_v47 = vcombine.low %v769_v3, %v785_v31  ;;  %v835_v48 = vcombine.high %v769_v3, %v785_v31 }
 0x2d4   :  { %v590_v49 = vrot.slane %v582_v40, %v4596_v45  ;;  %v597_v50 = vrot.slane %v583_v41, %v4596_v45  ;;  %v606_v51 = vrot.slane %v598_v42, %v4596_v45  ;;  %v613_v52 = vrot.slane %v599_v43, %v4596_v45  ;;  %v447_v53 = vpop.permute.xlu0 %446 }
 0x2d5   :  { %v826_v54 = vrot.slane %v818_v44, %v4596_v45  ;;  %v833_v55 = vrot.slane %v819_v46, %v4596_v45  ;;  %v842_v56 = vrot.slane %v834_v47, %v4596_v45  ;;  %v849_v57 = vrot.slane %v835_v48, %v4596_v45  ;;  %v429_v58 = vpop.permute.xlu1 %428 }
 0x2d6   :  { %v3873_v59 = vcombine.low %v590_v49, %v597_v50  ;;  %v3875_v60 = vcombine.high %v590_v49, %v597_v50  ;;  %v3877_v61 = vcombine.low %v606_v51, %v613_v52  ;;  %v3879_v62 = vcombine.high %v606_v51, %v613_v52 }
 0x2d7   :  { %v3882_v63 = vcombine.low %v826_v54, %v833_v55  ;;  %v3884_v0 = vcombine.high %v826_v54, %v833_v55  ;;  %v3886_v1 = vcombine.low %v842_v56, %v849_v57  ;;  %v3888_v2 = vcombine.high %v842_v56, %v849_v57 }
 0x2d8   :  { %v1342_v3 = vrot.slane %v3873_v59, %v4592_v38  ;;  %v1358_v4 = vrot.slane %v3875_v60, %v4592_v38  ;;  %v1374_v5 = vrot.slane %v3877_v61, %v4592_v38  ;;  %v1390_v6 = vrot.slane %v3879_v62, %v4592_v38  ;;  %v459_v7 = vpop.permute.xlu0 %458 }
 0x2d9   :  { %v4653_v8 = vrot.slane %v3882_v63, %v4592_v38  ;;  %v4656_v9 = vrot.slane %v3884_v0, %v4592_v38  ;;  %v4659_v10 = vrot.slane %v3886_v1, %v4592_v38  ;;  %v4662_v11 = vrot.slane %v3888_v2, %v4592_v38  ;;  %v4664_v12 = vpop.permute.xlu1 %408 }
 0x2da   :  { %v1398_v14 = vcombine.low %v1342_v3, %v1358_v4  ;;  %v1399_v28 = vcombine.high %v1342_v3, %v1358_v4  ;;  %v1430_v30 = vcombine.low %v1374_v5, %v1390_v6  ;;  %v1431_v29 = vcombine.high %v1374_v5, %v1390_v6 }
 0x2db   :  { %v722_v31 = vcombine.low %v4508_v15, %v417_v33  ;;  %v723_v40 = vcombine.high %v4508_v15, %v417_v33  ;;  %v738_v41 = vcombine.low %v4590_v36, %v429_v58  ;;  %v739_v42 = vcombine.high %v4590_v36, %v429_v58 }
 0x2dc   :  { %v4671_v43 = vrot.slane %v1398_v14, %v4596_v45  ;;  %v4674_v44 = vrot.slane %v1399_v28, %v4596_v45  ;;  %v4677_v46 = vrot.slane %v1430_v30, %v4596_v45  ;;  %v4680_v47 = vrot.slane %v1431_v29, %v4596_v45  ;;  %v471_v48 = vpop.permute.xlu0 %470 }
 0x2dd   :  { %v730_v49 = vrot.slane %v722_v31, %v4592_v38  ;;  %v737_v15 = vrot.slane %v723_v40, %v4592_v38  ;;  %v746_v33 = vrot.slane %v738_v41, %v4592_v38  ;;  %v753_v36 = vrot.slane %v739_v42, %v4592_v38  ;;  %v4686_v50 = vpop.permute.xlu1 %448 }
 0x2de   :  { %v1462_v51 = vcombine.low %v4671_v43, %v4677_v46  ;;  %v958_v52 = vcombine.low %v4528_v22, %v459_v7  ;;  %v959_v54 = vcombine.high %v4528_v22, %v459_v7  ;;  %v974_v55 = vcombine.low %v447_v53, %v471_v48 }
 0x2df   :  { %v786_v56 = vcombine.low %v730_v49, %v746_v33  ;;  %v787_v57 = vcombine.high %v730_v49, %v746_v33  ;;  %v802_v58 = vcombine.low %v737_v15, %v753_v36  ;;  %v803_v59 = vcombine.high %v737_v15, %v753_v36 }
 0x2e0   :  { %v4692_v60 = vmul.f32 0.17677669, %v1462_v51  ;;  %v966_v61 = vrot.slane %v958_v52, %v4592_v38  ;;  %v973_v62 = vrot.slane %v959_v54, %v4592_v38  ;;  %v975_v63 = vcombine.high %v447_v53, %v471_v48  ;;  %v419_v0 = vpop.permute.xlu0 %418 }
 0x2e1   :  { %v794_v1 = vrot.slane %v786_v56, %v4596_v45  ;;  %v801_v2 = vrot.slane %v787_v57, %v4596_v45  ;;  %v810_v3 = vrot.slane %v802_v58, %v4596_v45  ;;  %v817_v22 = vrot.slane %v803_v59, %v4596_v45  ;;  %v461_v14 = vpop.permute.xlu1 %460 }
 0x2e2   :  { %v982_v4 = vrot.slane %v974_v55, %v4592_v38  ;;  %v989_v5 = vrot.slane %v975_v63, %v4592_v38  ;;  %v926_v6 = vcombine.low %v4524_v21, %v419_v0  ;;  %v927_v7 = vcombine.high %v4524_v21, %v419_v0 }
 0x2e3   :  { %v3881_v28 = vcombine.low %v794_v1, %v801_v2  ;;  %v3883_v53 = vcombine.high %v794_v1, %v801_v2  ;;  %v3885_v30 = vcombine.low %v810_v3, %v817_v22  ;;  %v3887_v29 = vcombine.high %v810_v3, %v817_v22 }
 0x2e4   :  { %v1022_v31 = vcombine.low %v966_v61, %v982_v4  ;;  %v1023_v40 = vcombine.high %v966_v61, %v982_v4  ;;  %v1038_v41 = vcombine.low %v973_v62, %v989_v5  ;;  %v1039_v42 = vcombine.high %v973_v62, %v989_v5 }
 0x2e5   :  { %v1478_v48 = vrot.slane %v3881_v28, %v4592_v38  ;;  %v1494_v49 = vrot.slane %v3883_v53, %v4592_v38  ;;  %v1510_v15 = vrot.slane %v3885_v30, %v4592_v38  ;;  %v1526_v33 = vrot.slane %v3887_v29, %v4592_v38  ;;  %v473_v63 = vpop.permute.xlu1 %472 }
 0x2e6   :  { %v1030_v36 = vrot.slane %v1022_v31, %v4596_v45  ;;  %v1037_v21 = vrot.slane %v1023_v40, %v4596_v45  ;;  %v1046_v51 = vrot.slane %v1038_v41, %v4596_v45  ;;  %v1053_v52 = vrot.slane %v1039_v42, %v4596_v45 }
 0x2e7   :  { %v1534_v54 = vcombine.low %v1478_v48, %v1494_v49  ;;  %v1535_v55 = vcombine.high %v1478_v48, %v1494_v49  ;;  %v1566_v56 = vcombine.low %v1510_v15, %v1526_v33  ;;  %v1567_v57 = vcombine.high %v1510_v15, %v1526_v33 }
 0x2e8   :  { %v3894_v58 = vcombine.low %v1030_v36, %v1037_v21  ;;  %v3896_v59 = vcombine.high %v1030_v36, %v1037_v21  ;;  %v3898_v61 = vcombine.low %v1046_v51, %v1053_v52  ;;  %v3900_v62 = vcombine.high %v1046_v51, %v1053_v52 }
 0x2e9   :  { %v4713_v0 = vrot.slane %v1534_v54, %v4596_v45  ;;  %v4716_v1 = vrot.slane %v1535_v55, %v4596_v45  ;;  %v4719_v2 = vrot.slane %v1566_v56, %v4596_v45  ;;  %v4722_v3 = vrot.slane %v1567_v57, %v4596_v45  ;;  %v4779_v36 = vpop.permute.xlu1 %420 }
 0x2ea   :  { %v4725_v22 = vrot.slane %v3894_v58, %v4592_v38  ;;  %v4728_v4 = vrot.slane %v3896_v59, %v4592_v38  ;;  %v4731_v5 = vrot.slane %v3898_v61, %v4592_v38  ;;  %v4734_v28 = vrot.slane %v3900_v62, %v4592_v38 }
 0x2eb   :  { %v1598_v53 = vcombine.low %v4713_v0, %v4719_v2  ;;  %v934_v30 = vrot.slane %v926_v6, %v4592_v38  ;;  %v941_v29 = vrot.slane %v927_v7, %v4592_v38  ;;  %v1162_v31 = vcombine.low %v4534_v24, %v461_v14  ;;  %v431_v7 = vpop.permute.xlu0 %430 }
 0x2ec   :  { %v1163_v40 = vcombine.high %v4534_v24, %v461_v14  ;;  %v4746_v41 = vrot.slane %v1414_v34, %v4596_v45  ;;  %v4752_v42 = vrot.slane %v1446_v35, %v4596_v45  ;;  %v1550_v6 = vcombine.low %v4653_v8, %v4656_v9 }
 0x2ed   :  { %v4756_v48 = vmul.f32 0.17677669, %v1598_v53  ;;  %v1170_v24 = vrot.slane %v1162_v31, %v4592_v38  ;;  %v1582_v14 = vcombine.low %v4659_v10, %v4662_v11  ;;  %v4765_v34 = vrot.slane %v1415_v37, %v4596_v45  ;;  %v4810_v53 = vpop.permute.xlu1 %432 }
 0x2ee   :  { %v1177_v35 = vrot.slane %v1163_v40, %v4592_v38  ;;  %v1466_v49 = vcombine.low %v4746_v41, %v4752_v42  ;;  %v4771_v15 = vrot.slane %v1550_v6, %v4596_v45  ;;  %v4777_v33 = vrot.slane %v1447_v39, %v4596_v45 }
 0x2ef   :  { %v4782_v13 = vrot.slane %v1582_v14, %v4596_v45  ;;  %v1551_v16 = vcombine.high %v4653_v8, %v4656_v9  ;;  %v1583_v37 = vcombine.high %v4659_v10, %v4662_v11  ;;  %v942_v21 = vcombine.low %v4630_v32, %v431_v7 }
 0x2f0   :  { %v1468_v51 = vcombine.low %v4765_v34, %v4777_v33  ;;  %v943_v26 = vcombine.high %v4630_v32, %v431_v7  ;;  %v1178_v27 = vcombine.low %v4686_v50, %v473_v63  ;;  %v1179_v39 = vcombine.high %v4686_v50, %v473_v63 }
 0x2f1   :  { %v1602_v52 = vcombine.low %v4771_v15, %v4782_v13  ;;  %v4797_v54 = vrot.slane %v1551_v16, %v4596_v45  ;;  %v4800_v8 = vrot.slane %v1583_v37, %v4596_v45  ;;  %v950_v9 = vrot.slane %v942_v21, %v4592_v38 }
 0x2f2   :  { %v957_v10 = vrot.slane %v943_v26, %v4592_v38  ;;  %v1186_v11 = vrot.slane %v1178_v27, %v4592_v38  ;;  %v1193_v32 = vrot.slane %v1179_v39, %v4592_v38  ;;  %v1130_v50 = vcombine.low %v4532_v23, %v4779_v36  ;;  %v483_v26 = vpop.permute.xlu0 %482 }
 0x2f3   :  { %v2174_v55 = vpack.c.bf16 %v1602_v52, %v1466_v49  ;;  %v1604_v56 = vcombine.low %v4797_v54, %v4800_v8  ;;  %v990_v57 = vcombine.low %v934_v30, %v950_v9  ;;  %v991_v58 = vcombine.high %v934_v30, %v950_v9 }
 0x2f4   :  { %v1006_v59 = vcombine.low %v941_v29, %v957_v10  ;;  %v1007_v61 = vcombine.high %v941_v29, %v957_v10  ;;  %v1226_v62 = vcombine.low %v1170_v24, %v1186_v11  ;;  %v1227_v63 = vcombine.high %v1170_v24, %v1186_v11 }
 0x2f5   :  { %v2195_v31 = vsel %vm2190_vm1, %v2174_v55, 0  ;;  %v2176_v40 = vpack.c.bf16 %v1604_v56, %v1468_v51  ;;  %v998_v6 = vrot.slane %v990_v57, %v4596_v45  ;;  %v1005_v7 = vrot.slane %v991_v58, %v4596_v45 }
 0x2f6   :  { %4018 = vmatpush3.bf16.xpose.msra.mxu0 %v2195_v31  ;;  %v1014_v14 = vrot.slane %v1006_v59, %v4596_v45  ;;  %v1021_v49 = vrot.slane %v1007_v61, %v4596_v45  ;;  %v1234_v30 = vrot.slane %v1226_v62, %v4596_v45  ;;  %v1241_v29 = vrot.slane %v1227_v63, %v4596_v45 }
 0x2f7   :  { %v2289_v24 = vsel %vm2190_vm1, %v2176_v40, 0  ;;  %v3893_v16 = vcombine.low %v998_v6, %v1005_v7  ;;  %v3895_v37 = vcombine.high %v998_v6, %v1005_v7  ;;  %v1242_v21 = vcombine.low %v1177_v35, %v1193_v32  ;;  %4023 = vmatprep.subr.bf16.mxu0 %v4398_v25 }
 0x2f8   :  { %4030 = vmatpush3.bf16.xpose.msra.mxu1 %v2289_v24  ;;  %v3897_v51 = vcombine.low %v1014_v14, %v1021_v49  ;;  %v3899_v27 = vcombine.high %v1014_v14, %v1021_v49  ;;  %v1243_v39 = vcombine.high %v1177_v35, %v1193_v32  ;;  %v3902_v52 = vcombine.low %v1234_v30, %v1241_v29  ;;  %v4831_v35 = vpop.permute.xlu1 %484  ;;  %v507_v24 = vpop.permute.xlu0 %506 }
 0x2f9   :  { %v1750_v9 = vrot.slane %v3893_v16, %v4592_v38  ;;  %v1766_v10 = vrot.slane %v3895_v37, %v4592_v38  ;;  %v1250_v11 = vrot.slane %v1242_v21, %v4596_v45  ;;  %v3904_v55 = vcombine.high %v1234_v30, %v1241_v29  ;;  %4041 = vmatprep.subr.bf16.mxu1 %v4398_v25 }
 0x2fa   :  { %v1782_v56 = vrot.slane %v3897_v51, %v4592_v38  ;;  %v1798_v57 = vrot.slane %v3899_v27, %v4592_v38  ;;  %v1257_v58 = vrot.slane %v1243_v39, %v4596_v45  ;;  %v4829_v59 = vrot.slane %v3902_v52, %v4592_v38 }
 0x2fb   :  { %v1806_v32 = vcombine.low %v1750_v9, %v1766_v10  ;;  %v1807_v61 = vcombine.high %v1750_v9, %v1766_v10  ;;  %v4834_v62 = vrot.slane %v3904_v55, %v4592_v38  ;;  %v1131_v63 = vcombine.high %v4532_v23, %v4779_v36 }
 0x2fc   :  { %v1838_v31 = vcombine.low %v1782_v56, %v1798_v57  ;;  %v1839_v40 = vcombine.high %v1782_v56, %v1798_v57  ;;  %v3906_v6 = vcombine.low %v1250_v11, %v1257_v58  ;;  %v3908_v7 = vcombine.high %v1250_v11, %v1257_v58  ;;  %v495_v11 = vpop.permute.xlu1 %494 }
 0x2fd   :  { %v4839_v14 = vrot.slane %v1806_v32, %v4596_v45  ;;  %v4842_v49 = vrot.slane %v1807_v61, %v4596_v45  ;;  %v1138_v30 = vrot.slane %v1130_v50, %v4592_v38  ;;  %v1145_v29 = vrot.slane %v1131_v63, %v4592_v38 }
 0x2fe   :  { %v4847_v16 = vrot.slane %v1838_v31, %v4596_v45  ;;  %v4850_v23 = vrot.slane %v1839_v40, %v4596_v45  ;;  %v4853_v36 = vrot.slane %v3906_v6, %v4592_v38  ;;  %v4856_v37 = vrot.slane %v3908_v7, %v4592_v38 }
 0x2ff   :  { %v2166_v21 = vpack.c.bf16 %v4756_v48, %v4692_v60  ;;  %v1467_v50 = vcombine.high %v4746_v41, %v4752_v42  ;;  %v1603_v51 = vcombine.high %v4771_v15, %v4782_v13  ;;  %v1464_v27 = vcombine.low %v4674_v44, %v4680_v47 }
 0x300   :  { %v1600_v39 = vcombine.low %v4716_v1, %v4722_v3  ;;  %v670_v52 = vcombine.low %v483_v26, %v507_v24  ;;  %v671_v9 = vcombine.high %v483_v26, %v507_v24  ;;  %v1146_v10 = vcombine.low %v4664_v12, %v4810_v53 }
 0x301   :  { %4020 = vmatmul.mubr.msk.bf16.vlgmr.msra.gmra.mrb[8].mxu0 %vm2190_vm1, %v2166_v21  ;;  %v2175_v60 = vpack.c.bf16 %v1603_v51, %v1467_v50  ;;  %v2154_v48 = vmul.f32 0.17677669, %v1464_v27  ;;  %v1147_v41 = vcombine.high %v4664_v12, %v4810_v53  ;;  %v1463_v42 = vcombine.high %v4671_v43, %v4677_v46 }
 0x302   :  { %v2155_v15 = vmul.f32 0.17677669, %v1600_v39  ;;  %v678_v13 = vrot.slane %v670_v52, %v4592_v38  ;;  %v685_v55 = vrot.slane %v671_v9, %v4592_v38  ;;  %v1154_v26 = vrot.slane %v1146_v10, %v4592_v38  ;;  %4025 = vmatprep.mubr.msk.bf16.mxu0 %vm4399_vm0, %v4398_v25 }
 0x303   :  { %v2242_v56 = vsel %vm2190_vm1, %v2175_v60, 0  ;;  %v1161_v57 = vrot.slane %v1147_v41, %v4592_v38  ;;  %v1599_v12 = vcombine.high %v4713_v0, %v4719_v2  ;;  %v2152_v53 = vmul.f32 0.17677669, %v1463_v42 }
 0x304   :  { %4024 = vmatpush3.bf16.xpose.msra.mxu0 %v2242_v56  ;;  %v2168_v43 = vpack.c.bf16 %v2155_v15, %v2154_v48  ;;  %v1194_v46 = vcombine.low %v1138_v30, %v1154_v26  ;;  %v1195_v58 = vcombine.high %v1138_v30, %v1154_v26  ;;  %v1469_v32 = vcombine.high %v4765_v34, %v4777_v33  ;;  %v497_v30 = vpop.permute.xlu1 %496 }
 0x305   :  { %v1210_v61 = vcombine.low %v1145_v29, %v1161_v57  ;;  %v1211_v63 = vcombine.high %v1145_v29, %v1161_v57  ;;  %4035 = vmatprep.subr.bf16.mxu0 %v4398_v25  ;;  %v2153_v31 = vmul.f32 0.17677669, %v1599_v12  ;;  %v1605_v40 = vcombine.high %v4797_v54, %v4800_v8 }
 0x306   :  { %4032 = vmatmul.mubr.msk.bf16.vlgmr.msra.gmra.mrb[4].mxu1 %vm2190_vm1, %v2168_v43  ;;  %v1202_v0 = vrot.slane %v1194_v46, %v4596_v45  ;;  %v1209_v2 = vrot.slane %v1195_v58, %v4596_v45  ;;  %v654_v6 = vcombine.low %v4516_v18, %v495_v11  ;;  %v655_v7 = vcombine.high %v4516_v18, %v495_v11 }
 0x307   :  { %v1218_v34 = vrot.slane %v1210_v61, %v4596_v45  ;;  %v1225_v33 = vrot.slane %v1211_v63, %v4596_v45  ;;  %v2167_v29 = vpack.c.bf16 %v2153_v31, %v2152_v53  ;;  %v2177_v24 = vpack.c.bf16 %v1605_v40, %v1469_v32  ;;  %4043 = vmatprep.mubr.msk.bf16.mxu1 %vm4399_vm0, %v4398_v25 }
 0x308   :  { %v3901_v54 = vcombine.low %v1202_v0, %v1209_v2  ;;  %v3903_v8 = vcombine.high %v1202_v0, %v1209_v2  ;;  %v662_v21 = vrot.slane %v654_v6, %v4592_v38  ;;  %v669_v50 = vrot.slane %v655_v7, %v4592_v38 }
 0x309   :  { %v3905_v51 = vcombine.low %v1218_v34, %v1225_v33  ;;  %v3907_v27 = vcombine.high %v1218_v34, %v1225_v33  ;;  %v2336_v18 = vsel %vm2190_vm1, %v2177_v24, 0  ;;  %v858_v39 = vcombine.low %v4522_v20, %v497_v30  ;;  %v509_v34 = vpop.permute.xlu1 %508 }
 0x30a   :  { %v1886_v52 = vrot.slane %v3901_v54, %v4592_v38  ;;  %v1902_v9 = vrot.slane %v3903_v8, %v4592_v38  ;;  %v686_v10 = vcombine.low %v662_v21, %v678_v13  ;;  %v687_v11 = vcombine.high %v662_v21, %v678_v13 }
 0x30b   :  { %v1918_v60 = vrot.slane %v3905_v51, %v4592_v38  ;;  %v1934_v48 = vrot.slane %v3907_v27, %v4592_v38  ;;  %4026 = vmatmul.mubr.msk.bf16.vlgmr.msra.gmra.mrb[12].mxu0 %vm2190_vm1, %v2167_v29  ;;  %v702_v41 = vcombine.low %v669_v50, %v685_v55  ;;  %v703_v42 = vcombine.high %v669_v50, %v685_v55 }
 0x30c   :  { %v1942_v15 = vcombine.low %v1886_v52, %v1902_v9  ;;  %v1943_v26 = vcombine.high %v1886_v52, %v1902_v9  ;;  %4036 = vmatpush3.bf16.xpose.msra.mxu0 %v2336_v18  ;;  %v694_v56 = vrot.slane %v686_v10, %v4596_v45  ;;  %v701_v57 = vrot.slane %v687_v11, %v4596_v45 }
 0x30d   :  { %v1974_v12 = vcombine.low %v1918_v60, %v1934_v48  ;;  %v1975_v53 = vcombine.high %v1918_v60, %v1934_v48  ;;  %v710_v43 = vrot.slane %v702_v41, %v4596_v45  ;;  %v717_v13 = vrot.slane %v703_v42, %v4596_v45  ;;  %4037 = vmatprep.mubr.msk.bf16.mxu0 %vm4399_vm0, %v4398_v25 }
 0x30e   :  { %v4914_v46 = vrot.slane %v1942_v15, %v4596_v45  ;;  %v4917_v55 = vrot.slane %v1943_v26, %v4596_v45  ;;  %v1606_v58 = vcombine.low %v694_v56, %v701_v57  ;;  %v3889_v32 = vcombine.high %v694_v56, %v701_v57  ;;  %4047 = vmatprep.subr.bf16.mxu0 %v4398_v25 }
 0x30f   :  { %v4921_v61 = vrot.slane %v1974_v12, %v4596_v45  ;;  %v4924_v63 = vrot.slane %v1975_v53, %v4596_v45  ;;  %v1622_v31 = vcombine.low %v710_v43, %v717_v13  ;;  %v3890_v40 = vcombine.high %v710_v43, %v717_v13 }
 0x310   :  { %v4927_v0 = vrot.slane %v1606_v58, %v4592_v38  ;;  %v4930_v2 = vrot.slane %v3889_v32, %v4592_v38  ;;  %v859_v6 = vcombine.high %v4522_v20, %v497_v30  ;;  %v866_v7 = vrot.slane %v858_v39, %v4592_v38 }
 0x311   :  { %v4935_v33 = vrot.slane %v1622_v31, %v4592_v38  ;;  %v4938_v29 = vrot.slane %v3890_v40, %v4592_v38  ;;  %v1822_v24 = vcombine.low %v4725_v22, %v4728_v4  ;;  %v1854_v54 = vcombine.low %v4731_v5, %v4734_v28 }
 0x312   :  { %v873_v8 = vrot.slane %v859_v6, %v4592_v38  ;;  %v1958_v20 = vcombine.low %v4829_v59, %v4834_v62  ;;  %v1990_v30 = vcombine.low %v4853_v36, %v4856_v37  ;;  %v1465_v21 = vcombine.high %v4674_v44, %v4680_v47 }
 0x313   :  { %v1830_v50 = vrot.slane %v1822_v24, %v4596_v45  ;;  %v1862_v51 = vrot.slane %v1854_v54, %v4596_v45  ;;  %v1601_v27 = vcombine.high %v4716_v1, %v4722_v3  ;;  %v874_v18 = vcombine.low %v4831_v35, %v509_v34 }
 0x314   :  { %v1966_v39 = vrot.slane %v1958_v20, %v4596_v45  ;;  %v1998_v52 = vrot.slane %v1990_v30, %v4596_v45  ;;  %v2156_v9 = vmul.f32 0.17677669, %v1465_v21  ;;  %v875_v10 = vcombine.high %v4831_v35, %v509_v34 }
 0x315   :  { %v1874_v11 = vcombine.low %v1830_v50, %v1862_v51  ;;  %v2157_v60 = vmul.f32 0.17677669, %v1601_v27  ;;  %v1875_v48 = vcombine.high %v1830_v50, %v1862_v51  ;;  %v882_v44 = vrot.slane %v874_v18, %v4592_v38 }
 0x316   :  { %v2010_v47 = vcombine.low %v1966_v39, %v1998_v52  ;;  %v2011_v41 = vcombine.high %v1966_v39, %v1998_v52  ;;  %v889_v42 = vrot.slane %v875_v10, %v4592_v38  ;;  %v1870_v1 = vcombine.low %v4839_v14, %v4847_v16 }
 0x317   :  { %v2169_v3 = vpack.c.bf16 %v2157_v60, %v2156_v9  ;;  %v890_v15 = vcombine.low %v866_v7, %v882_v44  ;;  %v891_v26 = vcombine.high %v866_v7, %v882_v44  ;;  %v2006_v56 = vcombine.low %v4914_v46, %v4921_v61 }
 0x318   :  { %v2178_v57 = vpack.c.bf16 %v2010_v47, %v1874_v11  ;;  %v2179_v35 = vpack.c.bf16 %v2011_v41, %v1875_v48  ;;  %v906_v12 = vcombine.low %v873_v8, %v889_v42  ;;  %v907_v53 = vcombine.high %v873_v8, %v889_v42 }
 0x319   :  { %4038 = vmatmul.mubr.msk.bf16.vlgmr.msra.gmra.mrb[16].mxu0 %vm2190_vm1, %v2169_v3  ;;  %v898_v43 = vrot.slane %v890_v15, %v4596_v45  ;;  %v905_v13 = vrot.slane %v891_v26, %v4596_v45  ;;  %v2158_v58 = vmul.f32 0.17677669, %v1870_v1  ;;  %v2159_v32 = vmul.f32 0.17677669, %v2006_v56 }
 0x31a   :  { %v2383_v31 = vsel %vm2190_vm1, %v2178_v57, 0  ;;  %v2430_v40 = vsel %vm2190_vm1, %v2179_v35, 0  ;;  %v914_v6 = vrot.slane %v906_v12, %v4596_v45  ;;  %v921_v7 = vrot.slane %v907_v53, %v4596_v45  ;;  %4049 = vmatprep.mubr.msk.bf16.mxu0 %vm4399_vm0, %v4398_v25 }
 0x31b   :  { %4042 = vmatpush3.bf16.xpose.msra.mxu1 %v2383_v31  ;;  %4048 = vmatpush3.bf16.xpose.msra.mxu0 %v2430_v40  ;;  %v1674_v34 = vcombine.low %v898_v43, %v905_v13  ;;  %v3891_v24 = vcombine.high %v898_v43, %v905_v13  ;;  %v2170_v54 = vpack.c.bf16 %v2159_v32, %v2158_v58 }
 0x31c   :  { %v1690_v8 = vcombine.low %v914_v6, %v921_v7  ;;  %v3892_v20 = vcombine.high %v914_v6, %v921_v7  ;;  %4053 = vmatprep.subr.bf16.mxu1 %v4398_v25  ;;  %4059 = vmatprep.subr.bf16.mxu0 %v4398_v25  ;;  %v1871_v30 = vcombine.high %v4839_v14, %v4847_v16 }
 0x31d   :  { %v4979_v21 = vrot.slane %v1674_v34, %v4592_v38  ;;  %v4982_v50 = vrot.slane %v3891_v24, %v4592_v38  ;;  %v2007_v51 = vcombine.high %v4914_v46, %v4921_v61  ;;  %v1823_v27 = vcombine.high %v4725_v22, %v4728_v4 }
 0x31e   :  { %v1697_v18 = vrot.slane %v1690_v8, %v4592_v38  ;;  %v1705_v39 = vrot.slane %v3892_v20, %v4592_v38  ;;  %v2160_v52 = vmul.f32 0.17677669, %v1871_v30  ;;  %v1855_v14 = vcombine.high %v4731_v5, %v4734_v28 }
 0x31f   :  { %v2161_v16 = vmul.f32 0.17677669, %v2007_v51  ;;  %v1837_v9 = vrot.slane %v1823_v27, %v4596_v45  ;;  %v1959_v10 = vcombine.high %v4829_v59, %v4834_v62  ;;  %v1991_v46 = vcombine.high %v4853_v36, %v4856_v37 }
 0x320   :  { %v1869_v61 = vrot.slane %v1855_v14, %v4596_v45  ;;  %v1872_v22 = vcombine.low %v4842_v49, %v4850_v23  ;;  %v2008_v4 = vcombine.low %v4917_v55, %v4924_v63  ;;  %v1873_v5 = vcombine.high %v4842_v49, %v4850_v23 }
 0x321   :  { %v2171_v28 = vpack.c.bf16 %v2161_v16, %v2160_v52  ;;  %v1973_v11 = vrot.slane %v1959_v10, %v4596_v45  ;;  %v2005_v60 = vrot.slane %v1991_v46, %v4596_v45  ;;  %v2009_v59 = vcombine.high %v4917_v55, %v4924_v63 }
 0x322   :  { %4044 = vmatmul.mubr.msk.bf16.vlgmr.msra.gmra.mrb[8].mxu1 %vm2190_vm1, %v2170_v54  ;;  %v1876_v62 = vcombine.low %v1837_v9, %v1869_v61  ;;  %v1877_v36 = vcombine.high %v1837_v9, %v1869_v61  ;;  %v2162_v37 = vmul.f32 0.17677669, %v1872_v22  ;;  %v2163_v48 = vmul.f32 0.17677669, %v2008_v4 }
 0x323   :  { %4050 = vmatmul.mubr.msk.bf16.vlgmr.msra.gmra.mrb[20].mxu0 %vm2190_vm1, %v2171_v28  ;;  %v2012_v44 = vcombine.low %v1973_v11, %v2005_v60  ;;  %v2013_v47 = vcombine.high %v1973_v11, %v2005_v60  ;;  %4055 = vmatprep.mubr.msk.bf16.mxu1 %vm4399_vm0, %v4398_v25  ;;  %v2164_v49 = vmul.f32 0.17677669, %v1873_v5  ;;  %v2165_v23 = vmul.f32 0.17677669, %v2009_v59 }
 0x324   :  { %4061 = vmatprep.mubr.msk.bf16.mxu0 %vm4399_vm0, %v4398_v25  ;;  %v2172_v41 = vpack.c.bf16 %v2163_v48, %v2162_v37  ;;  %v1638_v55 = vcombine.low %v4927_v0, %v4930_v2  ;;  %v1654_v63 = vcombine.low %v4935_v33, %v4938_v29  ;;  %v1706_v42 = vcombine.low %v4979_v21, %v4982_v50 }
 0x325   :  { %v2180_v1 = vpack.c.bf16 %v2012_v44, %v1876_v62  ;;  %v2181_v3 = vpack.c.bf16 %v2013_v47, %v1877_v36  ;;  %v2173_v15 = vpack.c.bf16 %v2165_v23, %v2164_v49  ;;  %v1722_v26 = vcombine.low %v1697_v18, %v1705_v39 }
 0x326   :  { %v1646_v56 = vrot.slane %v1638_v55, %v4596_v45  ;;  %v1662_v57 = vrot.slane %v1654_v63, %v4596_v45  ;;  %v1714_v35 = vrot.slane %v1706_v42, %v4596_v45  ;;  %v1639_v12 = vcombine.high %v4927_v0, %v4930_v2 }
 0x327   :  { %v2477_v53 = vsel %vm2190_vm1, %v2180_v1, 0  ;;  %v2524_v43 = vsel %vm2190_vm1, %v2181_v3, 0  ;;  %v1730_v13 = vrot.slane %v1722_v26, %v4596_v45  ;;  %v1655_v58 = vcombine.high %v4935_v33, %v4938_v29 }
 0x328   :  { %4054 = vmatpush3.bf16.xpose.msra.mxu1 %v2477_v53  ;;  %4060 = vmatpush3.bf16.xpose.msra.mxu0 %v2524_v43  ;;  %v1670_v32 = vcombine.low %v1646_v56, %v1662_v57  ;;  %v1671_v31 = vcombine.high %v1646_v56, %v1662_v57  ;;  %v1653_v40 = vrot.slane %v1639_v12, %v4596_v45 }
 0x329   :  { %4065 = vmatprep.subr.bf16.mxu1 %v4398_v25  ;;  %4071 = vmatprep.subr.bf16.mxu0 %v4398_v25  ;;  %v1738_v0 = vcombine.low %v1714_v35, %v1730_v13  ;;  %v1739_v2 = vcombine.high %v1714_v35, %v1730_v13  ;;  %v1669_v6 = vrot.slane %v1655_v58, %v4596_v45 }
 0x32a   :  { %v1707_v7 = vcombine.high %v4979_v21, %v4982_v50  ;;  %v1723_v34 = vcombine.high %v1697_v18, %v1705_v39 }
 0x32b   :  { %v2182_v24 = vpack.c.bf16 %v1738_v0, %v1670_v32  ;;  %v2183_v33 = vpack.c.bf16 %v1739_v2, %v1671_v31  ;;  %v1672_v29 = vcombine.low %v1653_v40, %v1669_v6  ;;  %v1673_v54 = vcombine.high %v1653_v40, %v1669_v6 }
 0x32c   :  { %v1721_v8 = vrot.slane %v1707_v7, %v4596_v45  ;;  %v1737_v20 = vrot.slane %v1723_v34, %v4596_v45 }
 0x32e   :  { %v1740_v30 = vcombine.low %v1721_v8, %v1737_v20  ;;  %v1741_v51 = vcombine.high %v1721_v8, %v1737_v20 }
 0x32f   :  { %4056 = vmatmul.mubr.msk.bf16.vlgmr.msra.gmra.mrb[12].mxu1 %vm2190_vm1, %v2172_v41  ;;  %4062 = vmatmul.mubr.msk.bf16.vlgmr.msra.gmra.mrb[24].mxu0 %vm2190_vm1, %v2173_v15 }
 0x330   :  { %4066 = vmatpush3.bf16.msra.mxu1 %v2182_v24  ;;  %4072 = vmatpush3.bf16.msra.mxu0 %v2183_v33  ;;  %v5040_v27 = vpack.c.bf16 %v1740_v30, %v1672_v29  ;;  %v5042_v21 = vpack.c.bf16 %v1741_v51, %v1673_v54 }
 0x331   :  { %4067 = vmatprep.mubr.msk.bf16.mxu1 %vm4399_vm0, %v4398_v25  ;;  %4077 = vmatprep.subr.bf16.mxu1 %v4398_v25 }
 0x332   :  { %4073 = vmatprep.mubr.msk.bf16.mxu0 %vm4399_vm0, %v4398_v25  ;;  %4083 = vmatprep.subr.bf16.mxu0 %v4398_v25 }
 0x3d4   :  { %v5050_v50 = vpop.f32.mrb[8].mxu0 }
 0x3d5   :  { %v4021_v18 = vpop.f32.mrb[9].mxu0  ;;  %v2568_v39 = vsel %vm2567_vm2, %v5050_v50, -inf }
 0x3d6   :  { %2569 = vmax.xlane.f32.xlu0 %v2568_v39  ;;  %v5054_v52 = vpop.f32.mrb[10].mxu0 }
 0x3d7   :  { %v4022_v14 = vpop.f32.mrb[11].mxu0  ;;  %v2571_v16 = vsel %vm2567_vm2, %v5054_v52, -inf }
 0x3d8   :  { %2572 = vmax.xlane.f32.xlu1 %v2571_v16 }
 0x3d9   :  { %v5058_v9 = vpop.f32.mrb[4].mxu1 }
 0x3da   :  { %v4033_v10 = vpop.f32.mrb[5].mxu1  ;;  %v2580_v46 = vsel %vm2567_vm2, %v5058_v9, -inf }
 0x3db   :  { %v5062_v61 = vpop.f32.mrb[6].mxu1  ;;  %2581 = vmax.xlane.f32.xlu0 %v2580_v46 }
 0x3dc   :  { %v4034_v22 = vpop.f32.mrb[7].mxu1  ;;  %v2583_v4 = vsel %vm2567_vm2, %v5062_v61, -inf }
 0x3dd   :  { %2584 = vmax.xlane.f32.xlu1 %v2583_v4 }
 0x3de   :  { %v5066_v5 = vpop.f32.mrb[12].mxu0 }
 0x3df   :  { %v4027_v28 = vpop.f32.mrb[13].mxu0  ;;  %v2574_v11 = vsel %vm2567_vm2, %v5066_v5, -inf }
 0x3e0   :  { %2575 = vmax.xlane.f32.xlu0 %v2574_v11  ;;  %v5070_v60 = vpop.f32.mrb[14].mxu0 }
 0x3e1   :  { %v4028_v59 = vpop.f32.mrb[15].mxu0  ;;  %v2577_v15 = vsel %vm2567_vm2, %v5070_v60, -inf }
 0x3ec   :  { %v5072_v62 = vpop.f32.mrb[16].mxu0 }
 0x3ed   :  { %v4039_v36 = vpop.f32.mrb[17].mxu0  ;;  %v2586_v56 = vsel %vm2567_vm2, %v5072_v62, -inf }
 0x3ee   :  { %v5074_v37 = vpop.f32.mrb[18].mxu0 }
 0x3ef   :  { %v4040_v48 = vpop.f32.mrb[19].mxu0  ;;  %v2589_v26 = vsel %vm2567_vm2, %v5074_v37, -inf }
 0x3f5   :  { %v5076_v44 = vpop.f32.mrb[8].mxu1 }
 0x3f6   :  { %v5078_v47 = vpop.f32.mrb[20].mxu0  ;;  %v4045_v49 = vpop.f32.mrb[9].mxu1  ;;  %v2592_v23 = vsel %vm2567_vm2, %v5076_v44, -inf }
 0x3f7   :  { %v4051_v41 = vpop.f32.mrb[21].mxu0  ;;  %2593 = vmax.xlane.f32.xlu0 %v2592_v23  ;;  %v5082_v55 = vpop.f32.mrb[10].mxu1  ;;  %v2598_v0 = vsel %vm2567_vm2, %v5078_v47, -inf }
 0x3f8   :  { %v5084_v63 = vpop.f32.mrb[22].mxu0  ;;  %v4046_v42 = vpop.f32.mrb[11].mxu1  ;;  %v2595_v1 = vsel %vm2567_vm2, %v5082_v55, -inf }
 0x3f9   :  { %v4052_v3 = vpop.f32.mrb[23].mxu0  ;;  %2596 = vmax.xlane.f32.xlu1 %v2595_v1  ;;  %v2601_v6 = vsel %vm2567_vm2, %v5084_v63, -inf }
 0x3fb   :  { %2578 = vmax.xlane.f32.xlu0 %v2577_v15 }
 0x3fd   :  { %2590 = vmax.xlane.f32.xlu1 %v2589_v26 }
 0x3ff   :  { %2587 = vmax.xlane.f32.xlu0 %v2586_v56 }
 0x402   :  { %v5094_v57 = vpop.f32.mrb[24].mxu0  ;;  %v5096_v35 = vpop.f32.mrb[12].mxu1 }
 0x403   :  { %v4057_v12 = vpop.f32.mrb[13].mxu1  ;;  %v4063_v53 = vpop.f32.mrb[25].mxu0  ;;  %v2604_v43 = vsel %vm2567_vm2, %v5096_v35, -inf  ;;  %v2610_v2 = vsel %vm2567_vm2, %v5094_v57, -inf }
 0x404   :  { %v5100_v13 = vpop.f32.mrb[26].mxu0  ;;  %v5102_v58 = vpop.f32.mrb[14].mxu1  ;;  %2605 = vmax.xlane.f32.xlu0 %v2604_v43 }
 0x405   :  { %v4058_v32 = vpop.f32.mrb[15].mxu1  ;;  %v4064_v31 = vpop.f32.mrb[27].mxu0  ;;  %v2607_v40 = vsel %vm2567_vm2, %v5102_v58, -inf  ;;  %v2613_v7 = vsel %vm2567_vm2, %v5100_v13, -inf }
 0x406   :  { %2608 = vmax.xlane.f32.xlu1 %v2607_v40 }
 0x408   :  { %2599 = vmax.xlane.f32.xlu0 %v2598_v0 }
 0x417   :  { %488 = vrot.lane.b32.xlu1 %v4520_v19, %s4396_s1 }
 0x41b   :  { %498 = vrot.lane.b32.xlu1 %v4512_v17, %s4393_s0 }
 0x41e   :  { %486 = vrot.lane.b32.xlu0 %v4512_v17, %s4396_s1 }
 0x43d   :  { %2611 = vmax.xlane.f32.xlu0 %v2610_v2 }
 0x43f   :  { %2602 = vmax.xlane.f32.xlu1 %v2601_v6 }
 0x443   :  { %2614 = vmax.xlane.f32.xlu1 %v2613_v7 }
 0x453   :  { %510 = vrot.lane.b32.xlu0 %v4512_v17, %s4397_s2 }
 0x454   :  { %500 = vrot.lane.b32.xlu1 %v4520_v19, %s4393_s0 }
 0x463   :  { %v2570_v34 = vpop.xlane.xlu0 %2569 }
 0x464   :  { %v2616_v24 = vsub.f32 %v5050_v50, %v2570_v34 }
 0x465   :  { %v2573_v33 = vpop.xlane.xlu1 %2572 }
 0x466   :  { %v2632_v29 = vmul.f32 1.442695, %v2616_v24  ;;  %v2617_v54 = vsub.f32 %v5054_v52, %v2573_v33 }
 0x468   :  { %4228 = vpow2.f32 %v2632_v29  ;;  %v2634_v8 = vmul.f32 1.442695, %v2617_v54  ;;  %v2582_v20 = vpop.xlane.xlu0 %2581 }
 0x469   :  { %v2620_v30 = vsub.f32 %v5058_v9, %v2582_v20 }
 0x46a   :  { %4230 = vpow2.f32 %v2634_v8  ;;  %v2585_v51 = vpop.xlane.xlu1 %2584 }
 0x46b   :  { %v2640_v18 = vmul.f32 1.442695, %v2620_v30  ;;  %v2621_v39 = vsub.f32 %v5062_v61, %v2585_v51 }
 0x46d   :  { %4232 = vpow2.f32 %v2640_v18  ;;  %v2642_v14 = vmul.f32 1.442695, %v2621_v39  ;;  %v2576_v16 = vpop.xlane.xlu0 %2575 }
 0x46e   :  { %v2618_v10 = vsub.f32 %v5066_v5, %v2576_v16 }
 0x46f   :  { %4234 = vpow2.f32 %v2642_v14 }
 0x470   :  { %v2636_v50 = vmul.f32 1.442695, %v2618_v10 }
 0x472   :  { %v5129_v46 = vpop.eup %4228  ;;  %4236 = vpow2.f32 %v2636_v50 }
 0x473   :  { %v2664_v52 = vsel %vm2567_vm2, %v5129_v46, 0.0 }
 0x474   :  { %v5133_v22 = vpop.eup %4230  ;;  %2665 = vadd.xlane.f32.xlu0 %v2664_v52 }
 0x475   :  { %v2667_v9 = vsel %vm2567_vm2, %v5133_v22, 0.0 }
 0x477   :  { %v5137_v61 = vpop.eup %4232 }
 0x478   :  { %2668 = vadd.xlane.f32.xlu1 %v2667_v9  ;;  %v2676_v4 = vsel %vm2567_vm2, %v5137_v61, 0.0 }
 0x479   :  { %v5141_v5 = vpop.eup %4234  ;;  %2677 = vadd.xlane.f32.xlu0 %v2676_v4 }
 0x47a   :  { %v2679_v28 = vsel %vm2567_vm2, %v5141_v5, 0.0 }
 0x47c   :  { %v5145_v11 = vpop.eup %4236  ;;  %2680 = vadd.xlane.f32.xlu1 %v2679_v28 }
 0x47d   :  { %v2670_v59 = vsel %vm2567_vm2, %v5145_v11, 0.0 }
 0x47e   :  { %2671 = vadd.xlane.f32.xlu0 %v2670_v59 }
 0x484   :  { %v2594_v36 = vpop.xlane.xlu0 %2593 }
 0x485   :  { %v2624_v48 = vsub.f32 %v5076_v44, %v2594_v36 }
 0x486   :  { %v2597_v49 = vpop.xlane.xlu1 %2596 }
 0x487   :  { %v2648_v23 = vmul.f32 1.442695, %v2624_v48  ;;  %v2625_v41 = vsub.f32 %v5082_v55, %v2597_v49 }
 0x488   :  { %v2579_v42 = vpop.xlane.xlu0 %2578 }
 0x489   :  { %4238 = vpow2.f32 %v2648_v23  ;;  %v2619_v1 = vsub.f32 %v5070_v60, %v2579_v42  ;;  %v2650_v15 = vmul.f32 1.442695, %v2625_v41 }
 0x48a   :  { %v2591_v3 = vpop.xlane.xlu1 %2590 }
 0x48b   :  { %v2638_v26 = vmul.f32 1.442695, %v2619_v1  ;;  %v2623_v56 = vsub.f32 %v5074_v37, %v2591_v3 }
 0x48c   :  { %v2588_v12 = vpop.xlane.xlu0 %2587 }
 0x48d   :  { %4240 = vpow2.f32 %v2638_v26  ;;  %v2622_v53 = vsub.f32 %v5072_v62, %v2588_v12  ;;  %v2646_v43 = vmul.f32 1.442695, %v2623_v56 }
 0x48e   :  { %4242 = vpow2.f32 %v2650_v15 }
 0x48f   :  { %v2644_v44 = vmul.f32 1.442695, %v2622_v53 }
 0x491   :  { %4244 = vpow2.f32 %v2644_v44  ;;  %v2606_v32 = vpop.xlane.xlu0 %2605 }
 0x492   :  { %4246 = vpow2.f32 %v2646_v43  ;;  %v2628_v60 = vsub.f32 %v5096_v35, %v2606_v32 }
 0x493   :  { %v5154_v31 = vpop.eup %4238  ;;  %v5156_v55 = vpop.xlane.xlu1 %2608 }
 0x494   :  { %v2629_v40 = vsub.f32 %v5102_v58, %v5156_v55  ;;  %v2688_v37 = vsel %vm2567_vm2, %v5154_v31, 0.0  ;;  %v2656_v6 = vmul.f32 1.442695, %v2628_v60 }
 0x495   :  { %v2600_v0 = vpop.xlane.xlu0 %2599  ;;  %2689 = vadd.xlane.f32.xlu0 %v2688_v37 }
 0x496   :  { %v2626_v62 = vsub.f32 %v5078_v47, %v2600_v0 }
 0x497   :  { %v5164_v2 = vpop.eup %4240  ;;  %v5166_v7 = vpop.permute.xlu1 %488 }
 0x498   :  { %v2652_v34 = vmul.f32 1.442695, %v2626_v62  ;;  %v2673_v24 = vsel %vm2567_vm2, %v5164_v2, 0.0  ;;  %v5170_v35 = vpop.eup %4242 }
 0x499   :  { %2674 = vadd.xlane.f32.xlu1 %v2673_v24  ;;  %v2691_v8 = vsel %vm2567_vm2, %v5170_v35, 0.0  ;;  %v487_v16 = vpop.permute.xlu0 %486 }
 0x49a   :  { %4248 = vpow2.f32 %v2652_v34 }
 0x49b   :  { %v5172_v33 = vpop.eup %4244  ;;  %4250 = vpow2.f32 %v2656_v6  ;;  %v499_v29 = vpop.permute.xlu1 %498 }
 0x49c   :  { %v1062_v54 = vcombine.low %v4512_v17, %v499_v29  ;;  %v1063_v47 = vcombine.high %v4512_v17, %v499_v29  ;;  %v2682_v20 = vsel %vm2567_vm2, %v5172_v33, 0.0  ;;  %v5180_v30 = vpop.eup %4246 }
 0x49d   :  { %2692 = vadd.xlane.f32.xlu1 %v2691_v8  ;;  %2683 = vadd.xlane.f32.xlu0 %v2682_v20  ;;  %v2685_v51 = vsel %vm2567_vm2, %v5180_v30, 0.0 }
 0x49e   :  { %v1070_v49 = vrot.slane %v1062_v54, %v4592_v38  ;;  %v1077_v23 = vrot.slane %v1063_v47, %v4592_v38 }
 0x4a1   :  { %2686 = vadd.xlane.f32.xlu0 %v2685_v51 }
 0x4a4   :  { %v5184_v18 = vpop.eup %4248 }
 0x4a5   :  { %v5186_v39 = vpop.eup %4250  ;;  %v2694_v17 = vsel %vm2567_vm2, %v5184_v18, 0.0 }
 0x4a6   :  { %2695 = vadd.xlane.f32.xlu0 %v2694_v17  ;;  %v2700_v14 = vsel %vm2567_vm2, %v5186_v39, 0.0 }
 0x4aa   :  { %2701 = vadd.xlane.f32.xlu0 %v2700_v14 }
 0x4ca   :  { %v2612_v10 = vpop.xlane.xlu0 %2611 }
 0x4cb   :  { %v2630_v50 = vsub.f32 %v5094_v57, %v2612_v10 }
 0x4cc   :  { %v2603_v52 = vpop.xlane.xlu1 %2602 }
 0x4cd   :  { %v2627_v9 = vsub.f32 %v5084_v63, %v2603_v52  ;;  %v2660_v4 = vmul.f32 1.442695, %v2630_v50 }
 0x4ce   :  { %v511_v28 = vpop.permute.xlu0 %510 }
 0x4cf   :  { %v2654_v59 = vmul.f32 1.442695, %v2627_v9  ;;  %4252 = vpow2.f32 %v2660_v4  ;;  %v1078_v36 = vcombine.low %v487_v16, %v511_v28  ;;  %v1079_v48 = vcombine.high %v487_v16, %v511_v28 }
 0x4d0   :  { %v2615_v41 = vpop.xlane.xlu1 %2614 }
 0x4d1   :  { %4254 = vpow2.f32 %v2654_v59  ;;  %v2631_v42 = vsub.f32 %v5100_v13, %v2615_v41  ;;  %v1086_v1 = vrot.slane %v1078_v36, %v4592_v38  ;;  %v1093_v57 = vrot.slane %v1079_v48, %v4592_v38 }
 0x4d2   :  { %v2658_v41 = vmul.f32 1.442695, %v2629_v40 }
 0x4d3   :  { %v2662_v3 = vmul.f32 1.442695, %v2631_v42  ;;  %v1094_v63 = vcombine.low %v1070_v49, %v1086_v1  ;;  %v1095_v15 = vcombine.high %v1070_v49, %v1086_v1  ;;  %v1110_v26 = vcombine.low %v1077_v23, %v1093_v57 }
 0x4d4   :  { %v1111_v56 = vcombine.high %v1077_v23, %v1093_v57  ;;  %v5199_v12 = vpop.permute.xlu1 %500 }
 0x4d5   :  { %4256 = vpow2.f32 %v2662_v3  ;;  %v1102_v53 = vrot.slane %v1094_v63, %v4596_v45  ;;  %v1109_v43 = vrot.slane %v1095_v15, %v4596_v45  ;;  %v1118_v44 = vrot.slane %v1110_v26, %v4596_v45 }
 0x4d6   :  { %v1125_v13 = vrot.slane %v1111_v56, %v4596_v45  ;;  %v1266_v32 = vcombine.low %v4520_v19, %v5199_v12  ;;  %v1267_v60 = vcombine.high %v4520_v19, %v5199_v12  ;;  %4258 = vpow2.f32 %v2658_v41 }
 0x4d7   :  { %v2014_v37 = vcombine.low %v1102_v53, %v1109_v43  ;;  %v3909_v0 = vcombine.high %v1102_v53, %v1109_v43 }
 0x4d8   :  { %v2030_v62 = vcombine.low %v1118_v44, %v1125_v13  ;;  %v3910_v6 = vcombine.high %v1118_v44, %v1125_v13 }
 0x4d9   :  { %v5209_v34 = vpop.eup %4252  ;;  %v2021_v24 = vrot.slane %v2014_v37, %v4592_v38  ;;  %v2029_v29 = vrot.slane %v3909_v0, %v4592_v38 }
 0x4da   :  { %v2037_v54 = vrot.slane %v2030_v62, %v4592_v38  ;;  %v2045_v47 = vrot.slane %v3910_v6, %v4592_v38  ;;  %v2706_v8 = vsel %vm2567_vm2, %v5209_v34, 0.0 }
 0x4db   :  { %v5217_v20 = vpop.eup %4254  ;;  %2707 = vadd.xlane.f32.xlu0 %v2706_v8  ;;  %v2046_v51 = vcombine.low %v2021_v24, %v2029_v29  ;;  %v2047_v17 = vcombine.high %v2021_v24, %v2029_v29 }
 0x4dc   :  { %v2697_v14 = vsel %vm2567_vm2, %v5217_v20, 0.0  ;;  %v2062_v16 = vcombine.low %v2037_v54, %v2045_v47  ;;  %v2063_v10 = vcombine.high %v2037_v54, %v2045_v47 }
 0x4dd   :  { %2698 = vadd.xlane.f32.xlu1 %v2697_v14  ;;  %v5222_v50 = vrot.slane %v2046_v51, %v4596_v45  ;;  %v5225_v52 = vrot.slane %v2047_v17, %v4596_v45 }
 0x4de   :  { %v5228_v9 = vrot.slane %v2062_v16, %v4596_v45  ;;  %v5231_v4 = vrot.slane %v2063_v10, %v4596_v45 }
 0x4df   :  { %v5233_v28 = vpop.eup %4256 }
 0x4e0   :  { %v2709_v59 = vsel %vm2567_vm2, %v5233_v28, 0.0  ;;  %v2078_v36 = vcombine.low %v5222_v50, %v5228_v9  ;;  %v2079_v48 = vcombine.high %v5222_v50, %v5228_v9  ;;  %v2080_v49 = vcombine.low %v5225_v52, %v5231_v4  ;;  %v5250_v63 = vpop.eup %4258 }
 0x4e1   :  { %2710 = vadd.xlane.f32.xlu0 %v2709_v59  ;;  %v2081_v23 = vcombine.high %v5225_v52, %v5231_v4  ;;  %v2703_v58 = vsel %vm2567_vm2, %v5250_v63, 0.0 }
 0x4ee   :  { %512 = vrot.lane.b32.xlu1 %v4520_v19, %s4397_s2 }
 0x501   :  { %v2666_v42 = vpop.xlane.xlu0 %2665 }
 0x502   :  { %4260 = vrcp.f32 %v2666_v42 }
 0x505   :  { %v2669_v1 = vpop.xlane.xlu1 %2668 }
 0x506   :  { %4262 = vrcp.f32 %v2669_v1  ;;  %v2678_v57 = vpop.xlane.xlu0 %2677 }
 0x509   :  { %v2681_v3 = vpop.xlane.xlu1 %2680 }
 0x50a   :  { %4264 = vrcp.f32 %v2681_v3 }
 0x50b   :  { %4266 = vrcp.f32 %v2678_v57  ;;  %v2672_v13 = vpop.xlane.xlu0 %2671 }
 0x50c   :  { %v4261_v15 = vpop.eup %4260  ;;  %4268 = vrcp.f32 %v2672_v13 }
 0x50d   :  { %v2728_v56 = vmul.f32 %v4261_v15, %v5129_v46 }
 0x510   :  { %v4263_v26 = vpop.eup %4262 }
 0x511   :  { %v2729_v53 = vmul.f32 %v4263_v26, %v5133_v22 }
 0x512   :  { %2704 = vadd.xlane.f32.xlu1 %v2703_v58 }
 0x513   :  { %v2744_v55 = vpack.c.bf16 %v2729_v53, %v2728_v56 }
 0x514   :  { %v4265_v40 = vpop.eup %4264 }
 0x515   :  { %4068 = vmatmul.mubr.msk.bf16.vlgmr.msra.gmra.mrb[16].mxu1 %vm2567_vm2, %v2744_v55  ;;  %v4267_v43 = vpop.eup %4266  ;;  %v2733_v44 = vmul.f32 %v4265_v40, %v5141_v5 }
 0x516   :  { %4078 = vmatpush3.bf16.msra.mxu1 %v5040_v27  ;;  %4079 = vmatprep.mubr.msk.bf16.mxu1 %vm4399_vm0, %v4398_v25  ;;  %v2732_v46 = vmul.f32 %v4267_v43, %v5137_v61  ;;  %v4269_v6 = vpop.eup %4268 }
 0x517   :  { %4089 = vmatprep.subr.bf16.mxu1 %v4398_v25  ;;  %v2730_v24 = vmul.f32 %v4269_v6, %v5145_v11 }
 0x518   :  { %v2746_v22 = vpack.c.bf16 %v2733_v44, %v2732_v46 }
 0x51d   :  { %4080 = vmatmul.mubr.msk.bf16.vlgmr.msra.gmra.mrb[20].mxu1 %vm2567_vm2, %v2746_v22 }
 0x51e   :  { %4091 = vmatprep.mubr.msk.bf16.mxu1 %vm4399_vm0, %v4398_v25 }
 0x522   :  { %v2690_v37 = vpop.xlane.xlu0 %2689 }
 0x526   :  { %v2675_v0 = vpop.xlane.xlu1 %2674 }
 0x527   :  { %4270 = vrcp.f32 %v2675_v0 }
 0x52a   :  { %v2684_v27 = vpop.xlane.xlu0 %2683  ;;  %v2693_v11 = vpop.xlane.xlu1 %2692 }
 0x52b   :  { %4272 = vrcp.f32 %v2684_v27 }
 0x52e   :  { %v2687_v62 = vpop.xlane.xlu0 %2686 }
 0x52f   :  { %4274 = vrcp.f32 %v2687_v62 }
 0x530   :  { %4276 = vrcp.f32 %v2690_v37 }
 0x531   :  { %v4271_v5 = vpop.eup %4270  ;;  %4278 = vrcp.f32 %v2693_v11 }
 0x532   :  { %v2731_v61 = vmul.f32 %v4271_v5, %v5164_v2 }
 0x533   :  { %v2696_v2 = vpop.xlane.xlu0 %2695 }
 0x534   :  { %v2745_v29 = vpack.c.bf16 %v2731_v61, %v2730_v24 }
 0x535   :  { %v4273_v54 = vpop.eup %4272 }
 0x536   :  { %4074 = vmatmul.mubr.msk.bf16.vlgmr.msra.gmra.mrb[28].mxu0 %vm2567_vm2, %v2745_v29  ;;  %v2734_v8 = vmul.f32 %v4273_v54, %v5172_v33  ;;  %v1274_v33 = vrot.slane %v1266_v32, %v4592_v38 }
 0x537   :  { %4084 = vmatpush3.bf16.msra.mxu0 %v5042_v21  ;;  %4085 = vmatprep.mubr.msk.bf16.mxu0 %vm4399_vm0, %v4398_v25  ;;  %v5278_v21 = vpop.xlane.xlu0 %2701 }
 0x538   :  { %4095 = vmatprep.subr.bf16.mxu0 %v4398_v25 }
 0x539   :  { %v4275_v47 = vpop.eup %4274 }
 0x53a   :  { %v2735_v51 = vmul.f32 %v4275_v47, %v5180_v30  ;;  %v1281_v30 = vrot.slane %v1267_v60, %v4592_v38  ;;  %v4277_v22 = vpop.eup %4276 }
 0x53b   :  { %v4279_v13 = vpop.eup %4278 }
 0x53c   :  { %v2747_v17 = vpack.c.bf16 %v2735_v51, %v2734_v8  ;;  %v2737_v11 = vmul.f32 %v4279_v13, %v5170_v35  ;;  %v2736_v35 = vmul.f32 %v4277_v22, %v5154_v31 }
 0x53e   :  { %4086 = vmatmul.mubr.msk.bf16.vlgmr.msra.gmra.mrb[32].mxu0 %vm2567_vm2, %v2747_v17 }
 0x53f   :  { %4097 = vmatprep.mubr.msk.bf16.mxu0 %vm4399_vm0, %v4398_v25 }
 0x568   :  { %v2708_v41 = vpop.xlane.xlu0 %2707 }
 0x56a   :  { %v2699_v14 = vpop.xlane.xlu1 %2698 }
 0x56b   :  { %4280 = vrcp.f32 %v2699_v14 }
 0x56c   :  { %4282 = vrcp.f32 %v2696_v2 }
 0x56e   :  { %v513_v16 = vpop.permute.xlu1 %512  ;;  %v2711_v55 = vpop.xlane.xlu0 %2710 }
 0x56f   :  { %v1282_v10 = vcombine.low %v5166_v7, %v513_v16  ;;  %v1283_v59 = vcombine.high %v5166_v7, %v513_v16  ;;  %4284 = vrcp.f32 %v2711_v55 }
 0x570   :  { %4286 = vrcp.f32 %v2708_v41 }
 0x571   :  { %v1290_v42 = vrot.slane %v1282_v10, %v4592_v38  ;;  %v1297_v1 = vrot.slane %v1283_v59, %v4592_v38  ;;  %4288 = vrcp.f32 %v5278_v21 }
 0x573   :  { %v1298_v57 = vcombine.low %v1274_v33, %v1290_v42  ;;  %v1299_v7 = vcombine.high %v1274_v33, %v1290_v42  ;;  %v1314_v3 = vcombine.low %v1281_v30, %v1297_v1  ;;  %v1315_v15 = vcombine.high %v1281_v30, %v1297_v1 }
 0x575   :  { %v1306_v32 = vrot.slane %v1298_v57, %v4596_v45  ;;  %v1313_v26 = vrot.slane %v1299_v7, %v4596_v45  ;;  %v1322_v56 = vrot.slane %v1314_v3, %v4596_v45  ;;  %v1329_v19 = vrot.slane %v1315_v15, %v4596_v45  ;;  %v4281_v6 = vpop.eup %4280 }
 0x576   :  { %v4283_v54 = vpop.eup %4282  ;;  %v2739_v2 = vmul.f32 %v4281_v6, %v5217_v20 }
 0x577   :  { %v2082_v12 = vcombine.low %v1306_v32, %v1313_v26  ;;  %v3911_v60 = vcombine.high %v1306_v32, %v1313_v26  ;;  %v2098_v53 = vcombine.low %v1322_v56, %v1329_v19  ;;  %v3912_v58 = vcombine.high %v1322_v56, %v1329_v19 }
 0x578   :  { %v2738_v20 = vmul.f32 %v4283_v54, %v5184_v18 }
 0x579   :  { %v2089_v40 = vrot.slane %v2082_v12, %v4592_v38  ;;  %v2097_v43 = vrot.slane %v3911_v60, %v4592_v38  ;;  %v2105_v44 = vrot.slane %v2098_v53, %v4592_v38  ;;  %v2113_v46 = vrot.slane %v3912_v58, %v4592_v38  ;;  %v4285_v33 = vpop.eup %4284 }
 0x57a   :  { %v2749_v30 = vpack.c.bf16 %v2739_v2, %v2738_v20  ;;  %v4287_v50 = vpop.eup %4286  ;;  %v2743_v31 = vmul.f32 %v4285_v33, %v5233_v28 }
 0x57b   :  { %v2114_v37 = vcombine.low %v2089_v40, %v2097_v43  ;;  %v2130_v0 = vcombine.low %v2105_v44, %v2113_v46  ;;  %v2115_v27 = vcombine.high %v2089_v40, %v2097_v43  ;;  %v2131_v62 = vcombine.high %v2105_v44, %v2113_v46  ;;  %v4289_v4 = vpop.eup %4288 }
 0x57c   :  { %v2742_v18 = vmul.f32 %v4287_v50, %v5209_v34 }
 0x57d   :  { %v2122_v5 = vrot.slane %v2114_v37, %v4596_v45  ;;  %v2138_v24 = vrot.slane %v2130_v0, %v4596_v45  ;;  %v2129_v61 = vrot.slane %v2115_v27, %v4596_v45  ;;  %v2145_v29 = vrot.slane %v2131_v62, %v4596_v45 }
 0x57e   :  { %v2751_v52 = vpack.c.bf16 %v2743_v31, %v2742_v18 }
 0x57f   :  { %v2146_v47 = vcombine.low %v2122_v5, %v2138_v24  ;;  %v2147_v8 = vcombine.high %v2122_v5, %v2138_v24  ;;  %v2148_v51 = vcombine.low %v2129_v61, %v2145_v29  ;;  %v2149_v17 = vcombine.high %v2129_v61, %v2145_v29 }
 0x581   :  { %v2186_v14 = vpack.c.bf16 %v2146_v47, %v2078_v36  ;;  %v2187_v16 = vpack.c.bf16 %v2147_v8, %v2079_v48  ;;  %v2188_v10 = vpack.c.bf16 %v2148_v51, %v2080_v49  ;;  %v2189_v59 = vpack.c.bf16 %v2149_v17, %v2081_v23 }
 0x582   :  { %v2748_v36 = vpack.c.bf16 %v2737_v11, %v2736_v35  ;;  %v2740_v49 = vmul.f32 %v4289_v4, %v5186_v39 }
 0x583   :  { %4090 = vmatpush3.bf16.msra.mxu1 %v2186_v14  ;;  %4096 = vmatpush3.bf16.msra.mxu0 %v2187_v16 }
 0x584   :  { %4101 = vmatprep.subr.bf16.mxu1 %v4398_v25  ;;  %4107 = vmatprep.subr.bf16.mxu0 %v4398_v25 }
 0x586   :  { %4092 = vmatmul.mubr.msk.bf16.vlgmr.msra.gmra.mrb[24].mxu1 %vm2567_vm2, %v2748_v36  ;;  %4098 = vmatmul.mubr.msk.bf16.vlgmr.msra.gmra.mrb[36].mxu0 %vm2567_vm2, %v2749_v30 }
 0x587   :  { %4102 = vmatpush3.bf16.msra.mxu1 %v2188_v10  ;;  %4108 = vmatpush3.bf16.msra.mxu0 %v2189_v59 }
 0x588   :  { %4109 = vmatprep.mubr.msk.bf16.mxu0 %vm4399_vm0, %v4398_v25  ;;  %4103 = vmatprep.mubr.msk.bf16.mxu1 %vm4399_vm0, %v4398_v25 }
 0x58e   :  { %4110 = vmatmul.mubr.msk.bf16.vlgmr.msra.gmra.mrb[40].mxu0 %vm2567_vm2, %v2751_v52 }
 0x59f   :  { %v2705_v9 = vpop.xlane.xlu1 %2704 }
 0x5a0   :  { %4290 = vrcp.f32 %v2705_v9 }
 0x5aa   :  { %v4291_v48 = vpop.eup %4290 }
 0x5ab   :  { %v2741_v28 = vmul.f32 %v4291_v48, %v5250_v63 }
 0x5ad   :  { %v2750_v23 = vpack.c.bf16 %v2741_v28, %v2740_v49 }
 0x5af   :  { %4104 = vmatmul.mubr.msk.bf16.vlgmr.msra.gmra.mrb[28].mxu1 %vm2567_vm2, %v2750_v23 }
 0x5e8   :  { %v2789_v41 = vpop.f32.mrb[16].mxu1 }
 0x5e9   :  { %v4069_v25 = vpop.f32.mrb[17].mxu1 }
 0x5ea   :  { %v2792_v42 = vpop.f32.mrb[18].mxu1 }
 0x5eb   :  { %v4070_v34 = vpop.f32.mrb[19].mxu1 }
 0x5f0   :  { %v2877_v1 = vpop.f32.mrb[20].mxu1 }
 0x5f1   :  { %v3104_v57 = vcombine.low %v2789_v41, %v2877_v1  ;;  %v3105_v7 = vcombine.high %v2789_v41, %v2877_v1  ;;  %v4081_v3 = vpop.f32.mrb[21].mxu1 }
 0x5f2   :  { %v2880_v21 = vpop.f32.mrb[22].mxu1 }
 0x5f3   :  { %v3172_v15 = vcombine.low %v2792_v42, %v2880_v21  ;;  %v3173_v32 = vcombine.high %v2792_v42, %v2880_v21  ;;  %v4082_v26 = vpop.f32.mrb[23].mxu1  ;;  %v3112_v55 = vrot.slane %v3104_v57, %v4592_v38  ;;  %v3119_v40 = vrot.slane %v3105_v7, %v4592_v38 }
 0x5f5   :  { %v3180_v5 = vrot.slane %v3172_v15, %v4592_v38  ;;  %v3187_v24 = vrot.slane %v3173_v32, %v4592_v38 }
 0x609   :  { %v2833_v56 = vpop.f32.mrb[28].mxu0 }
 0x60a   :  { %v4075_v19 = vpop.f32.mrb[29].mxu0 }
 0x60b   :  { %v2836_v39 = vpop.f32.mrb[30].mxu0 }
 0x60c   :  { %v4076_v12 = vpop.f32.mrb[31].mxu0 }
 0x611   :  { %v2921_v63 = vpop.f32.mrb[32].mxu0 }
 0x612   :  { %v3120_v60 = vcombine.low %v2833_v56, %v2921_v63  ;;  %v3121_v53 = vcombine.high %v2833_v56, %v2921_v63  ;;  %v4087_v58 = vpop.f32.mrb[33].mxu0 }
 0x613   :  { %v2924_v43 = vpop.f32.mrb[34].mxu0 }
 0x614   :  { %v3128_v44 = vrot.slane %v3120_v60, %v4592_v38  ;;  %v3135_v46 = vrot.slane %v3121_v53, %v4592_v38  ;;  %v3188_v22 = vcombine.low %v2836_v39, %v2924_v43  ;;  %v3189_v13 = vcombine.high %v2836_v39, %v2924_v43  ;;  %v4088_v37 = vpop.f32.mrb[35].mxu0 }
 0x615   :  { %v4213_v37 = vld [vmem:[#allocation7 + $0x8] sm:$0xff]  }
 0x616   :  { %v3136_v0 = vcombine.low %v3112_v55, %v3128_v44  ;;  %v3137_v27 = vcombine.high %v3112_v55, %v3128_v44  ;;  %v3152_v62 = vcombine.low %v3119_v40, %v3135_v46  ;;  %v3153_v6 = vcombine.high %v3119_v40, %v3135_v46 }
 0x617   :  { %v3196_v61 = vrot.slane %v3188_v22, %v4592_v38  ;;  %v3203_v29 = vrot.slane %v3189_v13, %v4592_v38  ;;  %v4212_v13 = vld [vmem:[#allocation7] sm:$0xff]  }
 0x618   :  { %v3144_v54 = vrot.slane %v3136_v0, %v4596_v45  ;;  %v3151_v47 = vrot.slane %v3137_v27, %v4596_v45  ;;  %v3160_v8 = vrot.slane %v3152_v62, %v4596_v45  ;;  %v3167_v51 = vrot.slane %v3153_v6, %v4596_v45  ;;  %4113 = vmatprep.subr.bf16.mxu1 %v4212_v13  ;;  %v4214_v6 = vld [vmem:[#allocation7 + $0x10] sm:$0xff]  }
 0x619   :  { %v3204_v17 = vcombine.low %v3180_v5, %v3196_v61  ;;  %v3205_v11 = vcombine.high %v3180_v5, %v3196_v61  ;;  %v3220_v2 = vcombine.low %v3187_v24, %v3203_v29  ;;  %v3221_v14 = vcombine.high %v3187_v24, %v3203_v29  ;;  %4114 = vmatpush3.bf16.msra.mxu1 %v4212_v13  ;;  %v4215_v5 = vld [vmem:[#allocation7 + $0x18] sm:$0xff]   ;;  %v4216_v24 = vld [vmem:[#allocation7 + $0x20] sm:$0xff]  }
 0x61a   :  { %v3376_v16 = vcombine.low %v3144_v54, %v3151_v47  ;;  %v3929_v10 = vcombine.high %v3144_v54, %v3151_v47  ;;  %v3392_v59 = vcombine.low %v3160_v8, %v3167_v51  ;;  %v3930_v35 = vcombine.high %v3160_v8, %v3167_v51  ;;  %4115 = vmatprep.subr.bf16.mxu1 %v4213_v37 }
 0x61b   :  { %v3212_v20 = vrot.slane %v3204_v17, %v4596_v45  ;;  %v3219_v33 = vrot.slane %v3205_v11, %v4596_v45  ;;  %v3228_v36 = vrot.slane %v3220_v2, %v4596_v45  ;;  %v3235_v30 = vrot.slane %v3221_v14, %v4596_v45 }
 0x61c   :  { %v3383_v50 = vrot.slane %v3376_v16, %v4592_v38  ;;  %v3391_v31 = vrot.slane %v3929_v10, %v4592_v38  ;;  %v3399_v18 = vrot.slane %v3392_v59, %v4592_v38  ;;  %v3407_v52 = vrot.slane %v3930_v35, %v4592_v38 }
 0x61d   :  { %v3444_v9 = vcombine.low %v3212_v20, %v3219_v33  ;;  %v3931_v4 = vcombine.high %v3212_v20, %v3219_v33  ;;  %v3460_v48 = vcombine.low %v3228_v36, %v3235_v30  ;;  %v3932_v49 = vcombine.high %v3228_v36, %v3235_v30  ;;  %4116 = vmatpush3.bf16.msra.mxu1 %v4213_v37 }
 0x61e   :  { %v3409_v28 = vcombine.high %v3383_v50, %v3391_v31  ;;  %v3425_v23 = vcombine.high %v3399_v18, %v3407_v52  ;;  %v3408_v41 = vcombine.low %v3383_v50, %v3391_v31  ;;  %v3424_v25 = vcombine.low %v3399_v18, %v3407_v52  ;;  %4117 = vmatprep.subr.bf16.mxu1 %v4214_v6 }
 0x61f   :  { %v3451_v42 = vrot.slane %v3444_v9, %v4592_v38  ;;  %v3459_v34 = vrot.slane %v3931_v4, %v4592_v38  ;;  %v3467_v1 = vrot.slane %v3460_v48, %v4592_v38  ;;  %v3475_v57 = vrot.slane %v3932_v49, %v4592_v38 }
 0x620   :  { %v3423_v7 = vrot.slane %v3409_v28, %v4596_v45  ;;  %v3439_v3 = vrot.slane %v3425_v23, %v4596_v45  ;;  %v5362_v21 = vrot.slane %v3408_v41, %v4596_v45  ;;  %v5365_v15 = vrot.slane %v3424_v25, %v4596_v45 }
 0x621   :  { %v3477_v32 = vcombine.high %v3451_v42, %v3459_v34  ;;  %v3493_v26 = vcombine.high %v3467_v1, %v3475_v57  ;;  %v3476_v56 = vcombine.low %v3451_v42, %v3459_v34  ;;  %v3492_v19 = vcombine.low %v3467_v1, %v3475_v57  ;;  %4118 = vmatpush3.bf16.msra.mxu1 %v4214_v6 }
 0x622   :  { %v3442_v39 = vcombine.low %v3423_v7, %v3439_v3  ;;  %v3440_v12 = vcombine.low %v5362_v21, %v5365_v15  ;;  %v3441_v63 = vcombine.high %v5362_v21, %v5365_v15  ;;  %v3443_v60 = vcombine.high %v3423_v7, %v3439_v3  ;;  %4119 = vmatprep.subr.bf16.mxu1 %v4215_v5 }
 0x623   :  { %v3491_v53 = vrot.slane %v3477_v32, %v4596_v45  ;;  %v3507_v58 = vrot.slane %v3493_v26, %v4596_v45  ;;  %v5374_v55 = vrot.slane %v3476_v56, %v4596_v45  ;;  %v5377_v40 = vrot.slane %v3492_v19, %v4596_v45 }
 0x625   :  { %v3510_v43 = vcombine.low %v3491_v53, %v3507_v58  ;;  %v3509_v44 = vcombine.high %v5374_v55, %v5377_v40  ;;  %v3508_v46 = vcombine.low %v5374_v55, %v5377_v40  ;;  %v3511_v22 = vcombine.high %v3491_v53, %v3507_v58  ;;  %4120 = vmatpush3.bf16.msra.mxu1 %v4215_v5 }
 0x626   :  { %4121 = vmatprep.subr.bf16.mxu1 %v4216_v24 }
 0x627   :  { %v4155_v0 = vpack.i.bf16 %v3510_v43, %v3442_v39  ;;  %v4150_v27 = vpack.i.bf16 %v3509_v44, %v3441_v63  ;;  %v4170_v62 = vpack.i.bf16 %v3511_v22, %v3443_v60 }
 0x629   :  { %4156 = vrot.lane.b32.xlu1 %v4155_v0, %s4393_s0  ;;  %4151 = vrot.lane.b32.xlu0 %v4150_v27, %s4397_s2 }
 0x62a   :  { %4122 = vmatpush3.bf16.msra.mxu1 %v4216_v24 }
 0x62d   :  { %4171 = vrot.lane.b32.xlu0 %v4170_v62, %s4396_s1 }
 0x659   :  { %v2965_v61 = vpop.f32.mrb[24].mxu1  ;;  %v3009_v29 = vpop.f32.mrb[36].mxu0 }
 0x65a   :  { %v4093_v54 = vpop.f32.mrb[25].mxu1  ;;  %v4099_v47 = vpop.f32.mrb[37].mxu0 }
 0x65b   :  { %v2968_v8 = vpop.f32.mrb[26].mxu1  ;;  %v3012_v51 = vpop.f32.mrb[38].mxu0 }
 0x65c   :  { %v4094_v17 = vpop.f32.mrb[27].mxu1  ;;  %v4100_v11 = vpop.f32.mrb[39].mxu0 }
 0x661   :  { %v3097_v2 = vpop.f32.mrb[40].mxu0 }
 0x662   :  { %v3256_v14 = vcombine.low %v3009_v29, %v3097_v2  ;;  %v3257_v16 = vcombine.high %v3009_v29, %v3097_v2  ;;  %v4111_v10 = vpop.f32.mrb[41].mxu0  ;;  %v4217_v2 = vld [vmem:[#allocation7 + $0x28] sm:$0xff]  }
 0x663   :  { %v3100_v59 = vpop.f32.mrb[42].mxu0  ;;  %4123 = vmatprep.subr.bf16.mxu1 %v4217_v2 }
 0x664   :  { %v3324_v35 = vcombine.low %v3012_v51, %v3100_v59  ;;  %v3325_v20 = vcombine.high %v3012_v51, %v3100_v59  ;;  %v4112_v33 = vpop.f32.mrb[43].mxu0  ;;  %v3264_v18 = vrot.slane %v3256_v14, %v4592_v38  ;;  %v3271_v52 = vrot.slane %v3257_v16, %v4592_v38  ;;  %4124 = vmatpush3.bf16.msra.mxu1 %v4217_v2 }
 0x666   :  { %v3332_v1 = vrot.slane %v3324_v35, %v4592_v38  ;;  %v3339_v57 = vrot.slane %v3325_v20, %v4592_v38 }
 0x682   :  { %v3053_v36 = vpop.f32.mrb[28].mxu1 }
 0x683   :  { %v3240_v30 = vcombine.low %v2965_v61, %v3053_v36  ;;  %v3241_v50 = vcombine.high %v2965_v61, %v3053_v36  ;;  %v4105_v31 = vpop.f32.mrb[29].mxu1 }
 0x684   :  { %v3056_v9 = vpop.f32.mrb[30].mxu1 }
 0x685   :  { %v3248_v4 = vrot.slane %v3240_v30, %v4592_v38  ;;  %v3255_v48 = vrot.slane %v3241_v50, %v4592_v38  ;;  %v3308_v49 = vcombine.low %v2968_v8, %v3056_v9  ;;  %v3309_v28 = vcombine.high %v2968_v8, %v3056_v9  ;;  %v4106_v23 = vpop.f32.mrb[31].mxu1 }
 0x687   :  { %v3272_v41 = vcombine.low %v3248_v4, %v3264_v18  ;;  %v3273_v25 = vcombine.high %v3248_v4, %v3264_v18  ;;  %v3288_v42 = vcombine.low %v3255_v48, %v3271_v52  ;;  %v3289_v34 = vcombine.high %v3255_v48, %v3271_v52 }
 0x688   :  { %v3316_v7 = vrot.slane %v3308_v49, %v4592_v38  ;;  %v3323_v3 = vrot.slane %v3309_v28, %v4592_v38  ;;  %v4218_v49 = vld [vmem:[#allocation7 + $0x30] sm:$0xff]  }
 0x689   :  { %v3280_v32 = vrot.slane %v3272_v41, %v4596_v45  ;;  %v3287_v26 = vrot.slane %v3273_v25, %v4596_v45  ;;  %v3296_v56 = vrot.slane %v3288_v42, %v4596_v45  ;;  %v3303_v19 = vrot.slane %v3289_v34, %v4596_v45  ;;  %4125 = vmatprep.subr.bf16.mxu1 %v4218_v49 }
 0x68a   :  { %v3340_v39 = vcombine.low %v3316_v7, %v3332_v1  ;;  %v3341_v63 = vcombine.high %v3316_v7, %v3332_v1  ;;  %v3356_v60 = vcombine.low %v3323_v3, %v3339_v57  ;;  %v3357_v53 = vcombine.high %v3323_v3, %v3339_v57  ;;  %4126 = vmatpush3.bf16.msra.mxu1 %v4218_v49 }
 0x68b   :  { %v3512_v58 = vcombine.low %v3280_v32, %v3287_v26  ;;  %v3933_v43 = vcombine.high %v3280_v32, %v3287_v26  ;;  %v3528_v44 = vcombine.low %v3296_v56, %v3303_v19  ;;  %v3934_v22 = vcombine.high %v3296_v56, %v3303_v19  ;;  %v4219_v32 = vld [vmem:[#allocation7 + $0x38] sm:$0xff]  }
 0x68c   :  { %v3348_v13 = vrot.slane %v3340_v39, %v4596_v45  ;;  %v3355_v37 = vrot.slane %v3341_v63, %v4596_v45  ;;  %v3364_v0 = vrot.slane %v3356_v60, %v4596_v45  ;;  %v3371_v27 = vrot.slane %v3357_v53, %v4596_v45  ;;  %4127 = vmatprep.subr.bf16.mxu1 %v4219_v32 }
 0x68d   :  { %v3519_v62 = vrot.slane %v3512_v58, %v4592_v38  ;;  %v3527_v6 = vrot.slane %v3933_v43, %v4592_v38  ;;  %v3535_v5 = vrot.slane %v3528_v44, %v4592_v38  ;;  %v3543_v24 = vrot.slane %v3934_v22, %v4592_v38 }
 0x68e   :  { %v3580_v61 = vcombine.low %v3348_v13, %v3355_v37  ;;  %v3935_v29 = vcombine.high %v3348_v13, %v3355_v37  ;;  %v3596_v54 = vcombine.low %v3364_v0, %v3371_v27  ;;  %v3936_v47 = vcombine.high %v3364_v0, %v3371_v27  ;;  %4128 = vmatpush3.bf16.msra.mxu1 %v4219_v32 }
 0x68f   :  { %v3544_v8 = vcombine.low %v3519_v62, %v3527_v6  ;;  %v3560_v51 = vcombine.low %v3535_v5, %v3543_v24  ;;  %v3545_v17 = vcombine.high %v3519_v62, %v3527_v6  ;;  %v3561_v11 = vcombine.high %v3535_v5, %v3543_v24 }
 0x690   :  { %v3587_v14 = vrot.slane %v3580_v61, %v4592_v38  ;;  %v3595_v16 = vrot.slane %v3935_v29, %v4592_v38  ;;  %v3603_v10 = vrot.slane %v3596_v54, %v4592_v38  ;;  %v3611_v59 = vrot.slane %v3936_v47, %v4592_v38 }
 0x691   :  { %v3552_v35 = vrot.slane %v3544_v8, %v4596_v45  ;;  %v3568_v20 = vrot.slane %v3560_v51, %v4596_v45  ;;  %v3559_v33 = vrot.slane %v3545_v17, %v4596_v45  ;;  %v3575_v36 = vrot.slane %v3561_v11, %v4596_v45 }
 0x692   :  { %v3612_v30 = vcombine.low %v3587_v14, %v3595_v16  ;;  %v3628_v50 = vcombine.low %v3603_v10, %v3611_v59  ;;  %v3613_v31 = vcombine.high %v3587_v14, %v3595_v16  ;;  %v3629_v18 = vcombine.high %v3603_v10, %v3611_v59 }
 0x693   :  { %v3576_v52 = vcombine.low %v3552_v35, %v3568_v20  ;;  %v3577_v9 = vcombine.high %v3552_v35, %v3568_v20  ;;  %v3578_v4 = vcombine.low %v3559_v33, %v3575_v36  ;;  %v3579_v48 = vcombine.high %v3559_v33, %v3575_v36 }
 0x694   :  { %v3620_v38 = vrot.slane %v3612_v30, %v4596_v45  ;;  %v3636_v28 = vrot.slane %v3628_v50, %v4596_v45  ;;  %v3627_v23 = vrot.slane %v3613_v31, %v4596_v45  ;;  %v3643_v41 = vrot.slane %v3629_v18, %v4596_v45 }
 0x696   :  { %v3645_v25 = vcombine.high %v3620_v38, %v3636_v28  ;;  %v3644_v42 = vcombine.low %v3620_v38, %v3636_v28  ;;  %v3646_v34 = vcombine.low %v3627_v23, %v3643_v41  ;;  %v3647_v1 = vcombine.high %v3627_v23, %v3643_v41 }
 0x698   :  { %v4160_v57 = vpack.i.bf16 %v3645_v25, %v3577_v9  ;;  %v4165_v7 = vpack.i.bf16 %v3646_v34, %v3578_v4  ;;  %v4175_v3 = vpack.i.bf16 %v3647_v1, %v3579_v48 }
 0x69a   :  { %4161 = vrot.lane.b32.xlu1 %v4160_v57, %s4397_s2 }
 0x69b   :  { %v4157_v26 = vpop.permute.xlu1 %4156  ;;  %v4152_v56 = vpop.permute.xlu0 %4151 }
 0x69c   :  { %v4154_v19 = vunpack.i.h.bf16 %v4152_v56  ;;  %v4153_v39 = vunpack.i.l.bf16 %v4152_v56  ;;  %v4159_v63 = vunpack.i.h.bf16 %v4157_v26  ;;  %v4158_v45 = vunpack.i.l.bf16 %v4157_v26 }
 0x69e   :  { %4166 = vrot.lane.b32.xlu1 %v4165_v7, %s4393_s0  ;;  %v3697_v60 = vsel %vm2190_vm1, %v3508_v46, %v4154_v19  ;;  %v3696_v53 = vsel %vm2190_vm1, %v3440_v12, %v4153_v39 }
 0x69f   :  { %v4172_v58 = vpop.permute.xlu0 %4171  ;;  %v3701_v22 = vsel %vm3700_vm3, %v3696_v53, %v4158_v45  ;;  %v3702_v13 = vsel %vm3700_vm3, %v3697_v60, %v4159_v63 }
 0x6a0   :  { %v4174_v43 = vunpack.i.h.bf16 %v4172_v58  ;;  %v4173_v44 = vunpack.i.l.bf16 %v4172_v58 }
 0x6a2   :  { %4176 = vrot.lane.b32.xlu1 %v4175_v3, %s4396_s1  ;;  %v3706_v55 = vsel %vm3705_vm4, %v3701_v22, %v4173_v44  ;;  %v3707_v40 = vsel %vm3705_vm4, %v3702_v13, %v4174_v43 }
 0x6a3   :  { %v3710_v46 = vpack.c.bf16 %v3707_v40, %v3706_v55 }
 0x6a5   :  { %4129 = vmatprep.mubr.bf16.mxu1 %v3710_v46 }
 0x70c   :  { %v4162_v21 = vpop.permute.xlu1 %4161 }
 0x70d   :  { %v4164_v12 = vunpack.i.h.bf16 %v4162_v21  ;;  %v4163_v37 = vunpack.i.l.bf16 %v4162_v21 }
 0x70f   :  { %v3698_v6 = vsel %vm2190_vm1, %v3576_v52, %v4163_v37  ;;  %v3699_v5 = vsel %vm2190_vm1, %v3644_v42, %v4164_v12 }
 0x710   :  { %v4167_v15 = vpop.permute.xlu1 %4166 }
 0x711   :  { %v4169_v0 = vunpack.i.h.bf16 %v4167_v15  ;;  %v4168_v27 = vunpack.i.l.bf16 %v4167_v15 }
 0x713   :  { %v3703_v29 = vsel %vm3700_vm3, %v3698_v6, %v4168_v27  ;;  %v3704_v54 = vsel %vm3700_vm3, %v3699_v5, %v4169_v0 }
 0x714   :  { %v4177_v62 = vpop.permute.xlu1 %4176 }
 0x715   :  { %v4179_v24 = vunpack.i.h.bf16 %v4177_v62  ;;  %v4178_v61 = vunpack.i.l.bf16 %v4177_v62 }
 0x717   :  { %v3708_v47 = vsel %vm3705_vm4, %v3703_v29, %v4178_v61  ;;  %v3709_v8 = vsel %vm3705_vm4, %v3704_v54, %v4179_v24 }
 0x718   :  { %v3711_v51 = vpack.c.bf16 %v3709_v8, %v3708_v47 }
 0x71a   :  { %4130 = vmatmul.mubr.bf16.vlgmr.msra.gmra.mrb[32].mxu1 %v3711_v51 }
 0x7ed   :  { %v4131_v17 = vpop.f32.mrb[32].mxu1 }
 0x7ee   :  { %3827 = vst [vmem:[#allocation8 + $0x10] sm:$0xff] %v4131_v17  ;;  %v3810_v11 = vpop.f32.mrb[33].mxu1 }
 0x7ef   :  { %3825 = vst [vmem:[#allocation8] sm:$0xff] %v3810_v11  ;;  %v4132_v2 = vpop.f32.mrb[34].mxu1 }
 0x7f0   :  { %3828 = vst [vmem:[#allocation8 + $0x18] sm:$0xff] %v4132_v2  ;;  %v3813_v14 = vpop.f32.mrb[35].mxu1 }
 0x7f1   :  { %3826 = vst [vmem:[#allocation8 + $0x8] sm:$0xff] %v3813_v14 }
 0x7f2   :  { %4369 = shalt.err (!%p4366_p0)
}
 0x7f3   :  { %s4370_s16 = scalar_lea.hbm %s5459_s5, 512 }
 0x7f4   :  { %p4371_p1 = scmp.ne.s32.totalorder %s5459_s5, %s4370_s16  ;;  %p4374_p2 = scmp.lt.u32.totalorder %s4370_s16, %s5459_s5 }
 0x7f6   :  { %p4376_p3 = pnand %p4374_p2, %p4371_p1 }
 0x7f8   :  { %4379 = shalt.err (!%p4376_p3)
}
 0x7f9   :  { %3840 = dma.vmem_to_hbm [thread:$0]  %s3835_s12, 512, %s5459_s5, [#allocation4], %s4390_s3, %s4390_s3, %s4391_s17  }
 0x7fa   :  { %4384 = dma.done.wait [#allocation4], 512  }
 0x7fb   :  { %4385 = vsyncadd [#allocation4], 4294966784 }
 0x7fc   :  { %3844 = vsyncpa [#allocation3], 1 }
 0x7fd   :  { %3845 = vsyncpa [#allocation6], 1 }
 0x7fe   :  { %3846 = vsyncpa [#allocation4], 1 }

</bundles_post_ra>
